<compile_context>
chip_gen: v5e
topology: v5e:2x2
jax: 0.10.0
libtpu: 0.0.40
codegen_flags: <defaults>
</compile_context>

<pallas_src>
import math
import functools

import jax
import jax.numpy as jnp
from jax.experimental import pallas as pl
from jax.experimental.pallas import tpu as pltpu


def _layernorm(v, gamma, beta, eps=1e-5):
    mu = jnp.mean(v, axis=-1, keepdims=True)
    var = jnp.mean((v - mu) ** 2, axis=-1, keepdims=True)
    return (v - mu) * jax.lax.rsqrt(var + eps) * gamma + beta


def _gelu_tanh(u):
    c = math.sqrt(2.0 / math.pi)
    return 0.5 * u * (1.0 + jnp.tanh(c * (u + 0.044715 * u * u * u)))


def block_kernel(x_ref,
                 wqkv_ref, bqkv_ref, wpo_ref, bpo_ref,
                 g1_ref, be1_ref, g2_ref, be2_ref,
                 wfc_ref, bfc_ref, wp2_ref, bp2_ref,
                 out_ref,
                 q_scr, k_scr, v_scr, yacc_ref,
                 *, n_head, q_tile):
    T, C = x_ref.shape
    H = n_head
    hd = C // H
    cdt = wqkv_ref.dtype                       # matmul operand dtype (f32 or bf16)
    scale = 1.0 / math.sqrt(hd)
    TQ = q_tile

    row0 = pl.multiple_of(pl.program_id(1) * TQ, TQ)

    x_full = x_ref[...].astype(jnp.float32)                      # (T, C)
    x_tile = x_ref[pl.ds(row0, TQ), :].astype(jnp.float32)       # (TQ, C)

    # ---- ln_1 (f32) ----
    g1 = g1_ref[...]
    be1 = be1_ref[...]
    h_full = _layernorm(x_full, g1, be1)
    h_tile = _layernorm(x_tile, g1, be1)

    # ---- wide QKV projections (full MXU output width, f32 accumulation) ----
    # K,V for all T key positions; Q only for this query tile; 1/sqrt(hd) folded into q.
    kv = jnp.dot(h_full.astype(cdt), wqkv_ref[:, C:],
                 preferred_element_type=jnp.float32) + bqkv_ref[:, C:]        # (T, 2C)
    q = (jnp.dot(h_tile.astype(cdt), wqkv_ref[:, :C],
                 preferred_element_type=jnp.float32) + bqkv_ref[:, :C]) * scale  # (TQ, C)

    # ---- stage head-major (static data movement only) so the attention loop below
    #      needs no dynamic lane-offset slicing ----
    for h in range(H):
        q_scr[h] = q[:, h * hd:(h + 1) * hd].astype(cdt)
        k_scr[h] = kv[:, h * hd:(h + 1) * hd].astype(cdt)
        v_scr[h] = kv[:, C + h * hd:C + (h + 1) * hd].astype(cdt)

    # ---- causal mask for this q tile (built once, finite fill value) ----
    q_pos = row0 + jax.lax.broadcasted_iota(jnp.int32, (TQ, T), 0)
    k_pos = jax.lax.broadcasted_iota(jnp.int32, (TQ, T), 1)
    causal = q_pos >= k_pos

    # ---- attention: fori_loop over heads, head merge folded into output projection ----
    yacc_ref[...] = jnp.zeros_like(yacc_ref)

    def head_body(hi, carry):
        qh = q_scr[hi]                                            # (TQ, hd)
        kh = k_scr[hi]                                            # (T,  hd)
        vh = v_scr[hi]                                            # (T,  hd)
        s = jax.lax.dot_general(qh, kh, (((1,), (1,)), ((), ())),
                                preferred_element_type=jnp.float32)   # (TQ, T)
        s = jnp.where(causal, s, -1e30)
        p = jnp.exp(s - jnp.max(s, axis=-1, keepdims=True))
        p = p * pl.reciprocal(jnp.sum(p, axis=-1, keepdims=True), approx=True)
        o = jnp.dot(p.astype(cdt), vh, preferred_element_type=jnp.float32)    # (TQ, hd)
        yacc_ref[...] += jnp.dot(o.astype(cdt), wpo_ref[hi],
                                 preferred_element_type=jnp.float32)          # (TQ, C)
        return carry

    jax.lax.fori_loop(0, H, head_body, 0)

    x1 = x_tile + yacc_ref[...] + bpo_ref[...]                    # first residual

    # ---- ln_2 + MLP ----
    h2 = _layernorm(x1, g2_ref[...], be2_ref[...])
    u = jnp.dot(h2.astype(cdt), wfc_ref[...],
                preferred_element_type=jnp.float32) + bfc_ref[...]
    u = _gelu_tanh(u)
    m = jnp.dot(u.astype(cdt), wp2_ref[...],
                preferred_element_type=jnp.float32) + bp2_ref[...]

    out_ref[...] = (x1 + m).astype(out_ref.dtype)                 # second residual


def gpt2_block(x, params, n_head, *, compute_dtype=None, q_tile=None,
               single_buffer_weights=True, vmem_limit_bytes=48 * 1024 * 1024):
    """Fused GPT-2 Block forward.  Weights stored as (in, out); y = x @ W + b."""
    B, T, C = x.shape
    assert C % n_head == 0
    hd = C // n_head
    if compute_dtype is None:
        compute_dtype = x.dtype

    # Query-tile size: full sequence for moderate T, 256/128-row tiles for long T.
    if q_tile is None:
        q_tile = T
        for cand in (256, 128):
            if T > cand and T % cand == 0:
                q_tile = cand
                break
    assert T % q_tile == 0
    nt = T // q_tile

    f32 = jnp.float32
    w_qkv = params["w_qkv"].astype(compute_dtype)                           # (C, 3C)
    b_qkv = params["b_qkv"].astype(f32)                                     # (1, 3C)
    # Head-major output projection (H, hd, C): head merge is folded into it in-kernel.
    w_po_h = params["w_po"].reshape(n_head, hd, C).astype(compute_dtype)
    b_po = params["b_po"].astype(f32)
    w_fc = params["w_fc"].astype(compute_dtype)
    b_fc = params["b_fc"].astype(f32)
    w_p2 = params["w_p2"].astype(compute_dtype)
    b_p2 = params["b_p2"].astype(f32)
    g1, be1, g2, be2 = (params[k].astype(f32) for k in ("g1", "be1", "g2", "be2"))

    def wspec(shape):
        # Invariant across the grid -> keep a single resident copy (no double buffer).
        if single_buffer_weights:
            return pl.BlockSpec(shape, lambda b, t: (0,) * len(shape),
                                pipeline_mode=pl.Buffered(1))
        return pl.BlockSpec(shape, lambda b, t: (0,) * len(shape))

    kernel = functools.partial(block_kernel, n_head=n_head, q_tile=q_tile)

    return pl.pallas_call(
        kernel,
        out_shape=jax.ShapeDtypeStruct((B, T, C), x.dtype),
        grid=(B, nt),
        in_specs=[
            pl.BlockSpec((pl.Squeezed(), T, C), lambda b, t: (b, 0, 0)),    # x
            wspec((C, 3 * C)), wspec((1, 3 * C)),                           # c_attn
            wspec((n_head, hd, C)), wspec((1, C)),                          # attn c_proj
            wspec((1, C)), wspec((1, C)),                                   # ln_1
            wspec((1, C)), wspec((1, C)),                                   # ln_2
            wspec((C, 4 * C)), wspec((1, 4 * C)),                           # c_fc
            wspec((4 * C, C)), wspec((1, C)),                               # mlp c_proj
        ],
        out_specs=pl.BlockSpec((pl.Squeezed(), q_tile, C), lambda b, t: (b, t, 0)),
        scratch_shapes=[
            pltpu.VMEM((n_head, q_tile, hd), compute_dtype),                # q (head-major)
            pltpu.VMEM((n_head, T, hd), compute_dtype),                     # k
            pltpu.VMEM((n_head, T, hd), compute_dtype),                     # v
            pltpu.VMEM((q_tile, C), jnp.float32),                           # attn-out accum
        ],
        compiler_params=pltpu.CompilerParams(
            dimension_semantics=("parallel", "parallel"),
            vmem_limit_bytes=vmem_limit_bytes),
    )(x,
      w_qkv, b_qkv, w_po_h, b_po,
      g1, be1, g2, be2,
      w_fc, b_fc, w_p2, b_p2)


def reference_block(x, p, n_head):
    """Pure-JAX reference (mirrors the PyTorch Block forward)."""
    B, T, C = x.shape
    hd = C // n_head

    def ln(v, g, b):
        mu = jnp.mean(v, axis=-1, keepdims=True)
        var = jnp.mean((v - mu) ** 2, axis=-1, keepdims=True)
        return (v - mu) / jnp.sqrt(var + 1e-5) * g[0] + b[0]

    h = ln(x, p["g1"], p["be1"])
    qkv = h @ p["w_qkv"] + p["b_qkv"][0]
    q, k, v = jnp.split(qkv, 3, axis=-1)
    q = q.reshape(B, T, n_head, hd).transpose(0, 2, 1, 3)
    k = k.reshape(B, T, n_head, hd).transpose(0, 2, 1, 3)
    v = v.reshape(B, T, n_head, hd).transpose(0, 2, 1, 3)
    s = jnp.einsum("bhqd,bhkd->bhqk", q, k) / math.sqrt(hd)
    mask = jnp.tril(jnp.ones((T, T), dtype=bool))
    s = jnp.where(mask, s, -jnp.inf)
    a = jax.nn.softmax(s, axis=-1)
    y = jnp.einsum("bhqk,bhkd->bhqd", a, v).transpose(0, 2, 1, 3).reshape(B, T, C)
    y = y @ p["w_po"] + p["b_po"][0]
    x1 = x + y
    h2 = ln(x1, p["g2"], p["be2"])
    u = h2 @ p["w_fc"] + p["b_fc"][0]
    c = math.sqrt(2.0 / math.pi)
    u = 0.5 * u * (1.0 + jnp.tanh(c * (u + 0.044715 * u ** 3)))
    m = u @ p["w_p2"] + p["b_p2"][0]
    return x1 + m


if __name__ == "__main__":
    B, T, C, n_head = 2, 8, 32, 4

    key = jax.random.PRNGKey(0)
    ks = jax.random.split(key, 8)
    params = {
        "w_qkv": 0.02 * jax.random.normal(ks[0], (C, 3 * C), jnp.float32),
        "b_qkv": jnp.zeros((1, 3 * C), jnp.float32),
        "w_po":  0.02 * jax.random.normal(ks[1], (C, C), jnp.float32),
        "b_po":  jnp.zeros((1, C), jnp.float32),
        "g1":    jnp.ones((1, C), jnp.float32),
        "be1":   jnp.zeros((1, C), jnp.float32),
        "g2":    jnp.ones((1, C), jnp.float32),
        "be2":   jnp.zeros((1, C), jnp.float32),
        "w_fc":  0.02 * jax.random.normal(ks[2], (C, 4 * C), jnp.float32),
        "b_fc":  jnp.zeros((1, 4 * C), jnp.float32),
        "w_p2":  0.02 * jax.random.normal(ks[3], (4 * C, C), jnp.float32),
        "b_p2":  jnp.zeros((1, C), jnp.float32),
    }
    x = jax.random.normal(ks[4], (B, T, C), jnp.float32)
    ref = reference_block(x, params, n_head)

    # 1) f32 path with single-buffered resident weights; fall back to default
    #    double-buffering if this jax build does not accept pl.Buffered(1).
    single_buffer = True
    out = None
    try:
        out = jax.block_until_ready(
            gpt2_block(x, params, n_head, single_buffer_weights=True))
        if not jnp.allclose(out, ref, atol=1e-3, rtol=1e-3):
            single_buffer = False
    except Exception:
        single_buffer = False
    if not single_buffer:
        out = jax.block_until_ready(
            gpt2_block(x, params, n_head, single_buffer_weights=False))
    assert jnp.allclose(out, ref, atol=1e-3, rtol=1e-3), "f32 mismatch vs reference"

    # 2) bf16 matmul operands, f32 accumulation (looser tolerance).
    out_bf16 = jax.block_until_ready(
        gpt2_block(x, params, n_head, compute_dtype=jnp.bfloat16,
                   single_buffer_weights=single_buffer))
    assert jnp.allclose(out_bf16, ref, atol=3e-2, rtol=3e-2), "bf16 mismatch vs reference"

    # 3) multi-q-tile path: T=16 split into two q tiles of 8 (exercises the causal
    #    offset logic and the (batch, q_tile) parallel grid).
    x2 = jax.random.normal(ks[5], (B, 2 * T, C), jnp.float32)
    ref2 = reference_block(x2, params, n_head)
    out2 = jax.block_until_ready(
        gpt2_block(x2, params, n_head, q_tile=T,
                   single_buffer_weights=single_buffer))
    assert jnp.allclose(out2, ref2, atol=1e-3, rtol=1e-3), "multi-tile mismatch vs reference"

    print("KERNEL_OK")
</pallas_src>

<mosaic_0001>
module attributes {stable_mosaic.version = 11 : i64} {
  func.func @block_kernel(%arg0: i32, %arg1: i32, %arg2: memref<1x8x32xf32, #tpu.memory_space<vmem>>, %arg3: memref<32x96xf32, #tpu.memory_space<vmem>>, %arg4: memref<1x96xf32, #tpu.memory_space<vmem>>, %arg5: memref<4x8x32xf32, #tpu.memory_space<vmem>>, %arg6: memref<1x32xf32, #tpu.memory_space<vmem>>, %arg7: memref<1x32xf32, #tpu.memory_space<vmem>>, %arg8: memref<1x32xf32, #tpu.memory_space<vmem>>, %arg9: memref<1x32xf32, #tpu.memory_space<vmem>>, %arg10: memref<1x32xf32, #tpu.memory_space<vmem>>, %arg11: memref<32x128xf32, #tpu.memory_space<vmem>>, %arg12: memref<1x128xf32, #tpu.memory_space<vmem>>, %arg13: memref<128x32xf32, #tpu.memory_space<vmem>>, %arg14: memref<1x32xf32, #tpu.memory_space<vmem>>, %arg15: memref<1x8x32xf32, #tpu.memory_space<vmem>>, %arg16: memref<4x8x8xf32, #tpu.memory_space<vmem>>, %arg17: memref<4x8x8xf32, #tpu.memory_space<vmem>>, %arg18: memref<4x8x8xf32, #tpu.memory_space<vmem>>, %arg19: memref<8x32xf32, #tpu.memory_space<vmem>>) attributes {dimension_semantics = [#tpu.dimension_semantics<parallel>, #tpu.dimension_semantics<parallel>], iteration_bounds = array<i64: 2, 1>, scalar_prefetch = 0 : i64, scratch_operands = 4 : i64, tpu.core_type = #tpu.core_type<tc>, window_params = [{transform_indices = @transform_0, window_bounds = array<i64: 1, 8, 32>}, {pipeline_mode = #tpu.pipeline_mode<synchronous>, transform_indices = @transform_1, window_bounds = array<i64: 32, 96>}, {pipeline_mode = #tpu.pipeline_mode<synchronous>, transform_indices = @transform_2, window_bounds = array<i64: 1, 96>}, {pipeline_mode = #tpu.pipeline_mode<synchronous>, transform_indices = @transform_3, window_bounds = array<i64: 4, 8, 32>}, {pipeline_mode = #tpu.pipeline_mode<synchronous>, transform_indices = @transform_4, window_bounds = array<i64: 1, 32>}, {pipeline_mode = #tpu.pipeline_mode<synchronous>, transform_indices = @transform_5, window_bounds = array<i64: 1, 32>}, {pipeline_mode = #tpu.pipeline_mode<synchronous>, transform_indices = @transform_6, window_bounds = array<i64: 1, 32>}, {pipeline_mode = #tpu.pipeline_mode<synchronous>, transform_indices = @transform_7, window_bounds = array<i64: 1, 32>}, {pipeline_mode = #tpu.pipeline_mode<synchronous>, transform_indices = @transform_8, window_bounds = array<i64: 1, 32>}, {pipeline_mode = #tpu.pipeline_mode<synchronous>, transform_indices = @transform_9, window_bounds = array<i64: 32, 128>}, {pipeline_mode = #tpu.pipeline_mode<synchronous>, transform_indices = @transform_10, window_bounds = array<i64: 1, 128>}, {pipeline_mode = #tpu.pipeline_mode<synchronous>, transform_indices = @transform_11, window_bounds = array<i64: 128, 32>}, {pipeline_mode = #tpu.pipeline_mode<synchronous>, transform_indices = @transform_12, window_bounds = array<i64: 1, 32>}, {transform_indices = @transform_13, window_bounds = array<i64: 1, 8, 32>}]} {
    %c8_i32 = arith.constant 8 : i32
    %0 = arith.muli %arg1, %c8_i32 : i32
    %1 = tpu.assume_multiple %0, 8 : i32
    %c0 = arith.constant 0 : index
    %c0_0 = arith.constant 0 : index
    %c0_1 = arith.constant 0 : index
    %2 = vector.load %arg2[%c0, %c0_0, %c0_1] : memref<1x8x32xf32, #tpu.memory_space<vmem>>, vector<1x8x32xf32>
    %3 = vector.shape_cast %2 : vector<1x8x32xf32> to vector<8x32xf32>
    %c0_2 = arith.constant 0 : index
    %4 = arith.index_cast %1 : i32 to index
    %c0_3 = arith.constant 0 : index
    %5 = vector.load %arg2[%c0_2, %4, %c0_3] : memref<1x8x32xf32, #tpu.memory_space<vmem>>, vector<1x8x32xf32>
    %6 = vector.shape_cast %5 : vector<1x8x32xf32> to vector<8x32xf32>
    %c0_4 = arith.constant 0 : index
    %c0_5 = arith.constant 0 : index
    %7 = vector.load %arg7[%c0_4, %c0_5] : memref<1x32xf32, #tpu.memory_space<vmem>>, vector<1x32xf32>
    %c0_6 = arith.constant 0 : index
    %c0_7 = arith.constant 0 : index
    %8 = vector.load %arg8[%c0_6, %c0_7] : memref<1x32xf32, #tpu.memory_space<vmem>>, vector<1x32xf32>
    %cst = arith.constant dense<0.000000e+00> : vector<8xf32>
    %9 = vector.multi_reduction <add>, %3, %cst [1] : vector<8x32xf32> to vector<8xf32>
    %10 = vector.shape_cast %9 : vector<8xf32> to vector<8x1xf32>
    %cst_8 = arith.constant 3.200000e+01 : f32
    %11 = vector.broadcast %cst_8 : f32 to vector<8x1xf32>
    %12 = arith.divf %10, %11 : vector<8x1xf32>
    %13 = vector.broadcast %12 : vector<8x1xf32> to vector<8x32xf32>
    %14 = arith.subf %3, %13 : vector<8x32xf32>
    %15 = arith.mulf %14, %14 : vector<8x32xf32>
    %cst_9 = arith.constant dense<0.000000e+00> : vector<8xf32>
    %16 = vector.multi_reduction <add>, %15, %cst_9 [1] : vector<8x32xf32> to vector<8xf32>
    %17 = vector.shape_cast %16 : vector<8xf32> to vector<8x1xf32>
    %cst_10 = arith.constant 3.200000e+01 : f32
    %18 = vector.broadcast %cst_10 : f32 to vector<8x1xf32>
    %19 = arith.divf %17, %18 : vector<8x1xf32>
    %20 = vector.broadcast %12 : vector<8x1xf32> to vector<8x32xf32>
    %21 = arith.subf %3, %20 : vector<8x32xf32>
    %cst_11 = arith.constant 9.99999974E-6 : f32
    %22 = vector.broadcast %cst_11 : f32 to vector<8x1xf32>
    %23 = arith.addf %19, %22 : vector<8x1xf32>
    %24 = math.rsqrt %23 : vector<8x1xf32>
    %25 = vector.broadcast %24 : vector<8x1xf32> to vector<8x32xf32>
    %26 = arith.mulf %21, %25 : vector<8x32xf32>
    %27 = vector.broadcast %7 : vector<1x32xf32> to vector<8x32xf32>
    %28 = arith.mulf %26, %27 : vector<8x32xf32>
    %29 = vector.broadcast %8 : vector<1x32xf32> to vector<8x32xf32>
    %30 = arith.addf %28, %29 : vector<8x32xf32>
    %cst_12 = arith.constant dense<0.000000e+00> : vector<8xf32>
    %31 = vector.multi_reduction <add>, %6, %cst_12 [1] : vector<8x32xf32> to vector<8xf32>
    %32 = vector.shape_cast %31 : vector<8xf32> to vector<8x1xf32>
    %cst_13 = arith.constant 3.200000e+01 : f32
    %33 = vector.broadcast %cst_13 : f32 to vector<8x1xf32>
    %34 = arith.divf %32, %33 : vector<8x1xf32>
    %35 = vector.broadcast %34 : vector<8x1xf32> to vector<8x32xf32>
    %36 = arith.subf %6, %35 : vector<8x32xf32>
    %37 = arith.mulf %36, %36 : vector<8x32xf32>
    %cst_14 = arith.constant dense<0.000000e+00> : vector<8xf32>
    %38 = vector.multi_reduction <add>, %37, %cst_14 [1] : vector<8x32xf32> to vector<8xf32>
    %39 = vector.shape_cast %38 : vector<8xf32> to vector<8x1xf32>
    %cst_15 = arith.constant 3.200000e+01 : f32
    %40 = vector.broadcast %cst_15 : f32 to vector<8x1xf32>
    %41 = arith.divf %39, %40 : vector<8x1xf32>
    %42 = vector.broadcast %34 : vector<8x1xf32> to vector<8x32xf32>
    %43 = arith.subf %6, %42 : vector<8x32xf32>
    %cst_16 = arith.constant 9.99999974E-6 : f32
    %44 = vector.broadcast %cst_16 : f32 to vector<8x1xf32>
    %45 = arith.addf %41, %44 : vector<8x1xf32>
    %46 = math.rsqrt %45 : vector<8x1xf32>
    %47 = vector.broadcast %46 : vector<8x1xf32> to vector<8x32xf32>
    %48 = arith.mulf %43, %47 : vector<8x32xf32>
    %49 = vector.broadcast %7 : vector<1x32xf32> to vector<8x32xf32>
    %50 = arith.mulf %48, %49 : vector<8x32xf32>
    %51 = vector.broadcast %8 : vector<1x32xf32> to vector<8x32xf32>
    %52 = arith.addf %50, %51 : vector<8x32xf32>
    %c0_17 = arith.constant 0 : index
    %c32 = arith.constant 32 : index
    %53 = vector.load %arg3[%c0_17, %c32] : memref<32x96xf32, #tpu.memory_space<vmem>>, vector<32x64xf32>
    %cst_18 = arith.constant dense<0.000000e+00> : vector<8x64xf32>
    %54 = tpu.matmul %30, %53, %cst_18 {dimension_numbers = #tpu.dot_dimension_numbers<[1], [0], [0], [1], [0, 0, 1, 1], [], []>} : vector<8x32xf32>, vector<32x64xf32>, vector<8x64xf32> -> vector<8x64xf32>
    %c0_19 = arith.constant 0 : index
    %c32_20 = arith.constant 32 : index
    %55 = vector.load %arg4[%c0_19, %c32_20] : memref<1x96xf32, #tpu.memory_space<vmem>>, vector<1x64xf32>
    %56 = vector.broadcast %55 : vector<1x64xf32> to vector<8x64xf32>
    %57 = arith.addf %54, %56 : vector<8x64xf32>
    %c0_21 = arith.constant 0 : index
    %c0_22 = arith.constant 0 : index
    %58 = vector.load %arg3[%c0_21, %c0_22] : memref<32x96xf32, #tpu.memory_space<vmem>>, vector<32x32xf32>
    %cst_23 = arith.constant dense<0.000000e+00> : vector<8x32xf32>
    %59 = tpu.matmul %52, %58, %cst_23 {dimension_numbers = #tpu.dot_dimension_numbers<[1], [0], [0], [1], [0, 0, 1, 1], [], []>} : vector<8x32xf32>, vector<32x32xf32>, vector<8x32xf32> -> vector<8x32xf32>
    %c0_24 = arith.constant 0 : index
    %c0_25 = arith.constant 0 : index
    %60 = vector.load %arg4[%c0_24, %c0_25] : memref<1x96xf32, #tpu.memory_space<vmem>>, vector<1x32xf32>
    %61 = vector.broadcast %60 : vector<1x32xf32> to vector<8x32xf32>
    %62 = arith.addf %59, %61 : vector<8x32xf32>
    %cst_26 = arith.constant 0.353553385 : f32
    %63 = vector.broadcast %cst_26 : f32 to vector<8x32xf32>
    %64 = arith.mulf %62, %63 : vector<8x32xf32>
    %65 = vector.extract_strided_slice %64 {offsets = [0, 0], sizes = [8, 8], strides = [1, 1]} : vector<8x32xf32> to vector<8x8xf32>
    %c0_27 = arith.constant 0 : index
    %c0_28 = arith.constant 0 : index
    %c0_29 = arith.constant 0 : index
    %66 = vector.load %arg16[%c0_27, %c0_28, %c0_29] : memref<4x8x8xf32, #tpu.memory_space<vmem>>, vector<1x8x8xf32>
    %67 = vector.shape_cast %66 : vector<1x8x8xf32> to vector<8x8xf32>
    %68 = vector.shape_cast %65 : vector<8x8xf32> to vector<1x8x8xf32>
    tpu.vector_store %arg16[%c0_27, %c0_28, %c0_29], %68 {strides = array<i32>} : memref<4x8x8xf32, #tpu.memory_space<vmem>>, vector<1x8x8xf32>,
    %69 = vector.extract_strided_slice %57 {offsets = [0, 0], sizes = [8, 8], strides = [1, 1]} : vector<8x64xf32> to vector<8x8xf32>
    %c0_30 = arith.constant 0 : index
    %c0_31 = arith.constant 0 : index
    %c0_32 = arith.constant 0 : index
    %70 = vector.load %arg17[%c0_30, %c0_31, %c0_32] : memref<4x8x8xf32, #tpu.memory_space<vmem>>, vector<1x8x8xf32>
    %71 = vector.shape_cast %70 : vector<1x8x8xf32> to vector<8x8xf32>
    %72 = vector.shape_cast %69 : vector<8x8xf32> to vector<1x8x8xf32>
    tpu.vector_store %arg17[%c0_30, %c0_31, %c0_32], %72 {strides = array<i32>} : memref<4x8x8xf32, #tpu.memory_space<vmem>>, vector<1x8x8xf32>,
    %73 = vector.extract_strided_slice %57 {offsets = [0, 32], sizes = [8, 8], strides = [1, 1]} : vector<8x64xf32> to vector<8x8xf32>
    %c0_33 = arith.constant 0 : index
    %c0_34 = arith.constant 0 : index
    %c0_35 = arith.constant 0 : index
    %74 = vector.load %arg18[%c0_33, %c0_34, %c0_35] : memref<4x8x8xf32, #tpu.memory_space<vmem>>, vector<1x8x8xf32>
    %75 = vector.shape_cast %74 : vector<1x8x8xf32> to vector<8x8xf32>
    %76 = vector.shape_cast %73 : vector<8x8xf32> to vector<1x8x8xf32>
    tpu.vector_store %arg18[%c0_33, %c0_34, %c0_35], %76 {strides = array<i32>} : memref<4x8x8xf32, #tpu.memory_space<vmem>>, vector<1x8x8xf32>,
    %77 = vector.extract_strided_slice %64 {offsets = [0, 8], sizes = [8, 8], strides = [1, 1]} : vector<8x32xf32> to vector<8x8xf32>
    %c1 = arith.constant 1 : index
    %c0_36 = arith.constant 0 : index
    %c0_37 = arith.constant 0 : index
    %78 = vector.load %arg16[%c1, %c0_36, %c0_37] : memref<4x8x8xf32, #tpu.memory_space<vmem>>, vector<1x8x8xf32>
    %79 = vector.shape_cast %78 : vector<1x8x8xf32> to vector<8x8xf32>
    %80 = vector.shape_cast %77 : vector<8x8xf32> to vector<1x8x8xf32>
    tpu.vector_store %arg16[%c1, %c0_36, %c0_37], %80 {strides = array<i32>} : memref<4x8x8xf32, #tpu.memory_space<vmem>>, vector<1x8x8xf32>,
    %81 = vector.extract_strided_slice %57 {offsets = [0, 8], sizes = [8, 8], strides = [1, 1]} : vector<8x64xf32> to vector<8x8xf32>
    %c1_38 = arith.constant 1 : index
    %c0_39 = arith.constant 0 : index
    %c0_40 = arith.constant 0 : index
    %82 = vector.load %arg17[%c1_38, %c0_39, %c0_40] : memref<4x8x8xf32, #tpu.memory_space<vmem>>, vector<1x8x8xf32>
    %83 = vector.shape_cast %82 : vector<1x8x8xf32> to vector<8x8xf32>
    %84 = vector.shape_cast %81 : vector<8x8xf32> to vector<1x8x8xf32>
    tpu.vector_store %arg17[%c1_38, %c0_39, %c0_40], %84 {strides = array<i32>} : memref<4x8x8xf32, #tpu.memory_space<vmem>>, vector<1x8x8xf32>,
    %85 = vector.extract_strided_slice %57 {offsets = [0, 40], sizes = [8, 8], strides = [1, 1]} : vector<8x64xf32> to vector<8x8xf32>
    %c1_41 = arith.constant 1 : index
    %c0_42 = arith.constant 0 : index
    %c0_43 = arith.constant 0 : index
    %86 = vector.load %arg18[%c1_41, %c0_42, %c0_43] : memref<4x8x8xf32, #tpu.memory_space<vmem>>, vector<1x8x8xf32>
    %87 = vector.shape_cast %86 : vector<1x8x8xf32> to vector<8x8xf32>
    %88 = vector.shape_cast %85 : vector<8x8xf32> to vector<1x8x8xf32>
    tpu.vector_store %arg18[%c1_41, %c0_42, %c0_43], %88 {strides = array<i32>} : memref<4x8x8xf32, #tpu.memory_space<vmem>>, vector<1x8x8xf32>,
    %89 = vector.extract_strided_slice %64 {offsets = [0, 16], sizes = [8, 8], strides = [1, 1]} : vector<8x32xf32> to vector<8x8xf32>
    %c2 = arith.constant 2 : index
    %c0_44 = arith.constant 0 : index
    %c0_45 = arith.constant 0 : index
    %90 = vector.load %arg16[%c2, %c0_44, %c0_45] : memref<4x8x8xf32, #tpu.memory_space<vmem>>, vector<1x8x8xf32>
    %91 = vector.shape_cast %90 : vector<1x8x8xf32> to vector<8x8xf32>
    %92 = vector.shape_cast %89 : vector<8x8xf32> to vector<1x8x8xf32>
    tpu.vector_store %arg16[%c2, %c0_44, %c0_45], %92 {strides = array<i32>} : memref<4x8x8xf32, #tpu.memory_space<vmem>>, vector<1x8x8xf32>,
    %93 = vector.extract_strided_slice %57 {offsets = [0, 16], sizes = [8, 8], strides = [1, 1]} : vector<8x64xf32> to vector<8x8xf32>
    %c2_46 = arith.constant 2 : index
    %c0_47 = arith.constant 0 : index
    %c0_48 = arith.constant 0 : index
    %94 = vector.load %arg17[%c2_46, %c0_47, %c0_48] : memref<4x8x8xf32, #tpu.memory_space<vmem>>, vector<1x8x8xf32>
    %95 = vector.shape_cast %94 : vector<1x8x8xf32> to vector<8x8xf32>
    %96 = vector.shape_cast %93 : vector<8x8xf32> to vector<1x8x8xf32>
    tpu.vector_store %arg17[%c2_46, %c0_47, %c0_48], %96 {strides = array<i32>} : memref<4x8x8xf32, #tpu.memory_space<vmem>>, vector<1x8x8xf32>,
    %97 = vector.extract_strided_slice %57 {offsets = [0, 48], sizes = [8, 8], strides = [1, 1]} : vector<8x64xf32> to vector<8x8xf32>
    %c2_49 = arith.constant 2 : index
    %c0_50 = arith.constant 0 : index
    %c0_51 = arith.constant 0 : index
    %98 = vector.load %arg18[%c2_49, %c0_50, %c0_51] : memref<4x8x8xf32, #tpu.memory_space<vmem>>, vector<1x8x8xf32>
    %99 = vector.shape_cast %98 : vector<1x8x8xf32> to vector<8x8xf32>
    %100 = vector.shape_cast %97 : vector<8x8xf32> to vector<1x8x8xf32>
    tpu.vector_store %arg18[%c2_49, %c0_50, %c0_51], %100 {strides = array<i32>} : memref<4x8x8xf32, #tpu.memory_space<vmem>>, vector<1x8x8xf32>,
    %101 = vector.extract_strided_slice %64 {offsets = [0, 24], sizes = [8, 8], strides = [1, 1]} : vector<8x32xf32> to vector<8x8xf32>
    %c3 = arith.constant 3 : index
    %c0_52 = arith.constant 0 : index
    %c0_53 = arith.constant 0 : index
    %102 = vector.load %arg16[%c3, %c0_52, %c0_53] : memref<4x8x8xf32, #tpu.memory_space<vmem>>, vector<1x8x8xf32>
    %103 = vector.shape_cast %102 : vector<1x8x8xf32> to vector<8x8xf32>
    %104 = vector.shape_cast %101 : vector<8x8xf32> to vector<1x8x8xf32>
    tpu.vector_store %arg16[%c3, %c0_52, %c0_53], %104 {strides = array<i32>} : memref<4x8x8xf32, #tpu.memory_space<vmem>>, vector<1x8x8xf32>,
    %105 = vector.extract_strided_slice %57 {offsets = [0, 24], sizes = [8, 8], strides = [1, 1]} : vector<8x64xf32> to vector<8x8xf32>
    %c3_54 = arith.constant 3 : index
    %c0_55 = arith.constant 0 : index
    %c0_56 = arith.constant 0 : index
    %106 = vector.load %arg17[%c3_54, %c0_55, %c0_56] : memref<4x8x8xf32, #tpu.memory_space<vmem>>, vector<1x8x8xf32>
    %107 = vector.shape_cast %106 : vector<1x8x8xf32> to vector<8x8xf32>
    %108 = vector.shape_cast %105 : vector<8x8xf32> to vector<1x8x8xf32>
    tpu.vector_store %arg17[%c3_54, %c0_55, %c0_56], %108 {strides = array<i32>} : memref<4x8x8xf32, #tpu.memory_space<vmem>>, vector<1x8x8xf32>,
    %109 = vector.extract_strided_slice %57 {offsets = [0, 56], sizes = [8, 8], strides = [1, 1]} : vector<8x64xf32> to vector<8x8xf32>
    %c3_57 = arith.constant 3 : index
    %c0_58 = arith.constant 0 : index
    %c0_59 = arith.constant 0 : index
    %110 = vector.load %arg18[%c3_57, %c0_58, %c0_59] : memref<4x8x8xf32, #tpu.memory_space<vmem>>, vector<1x8x8xf32>
    %111 = vector.shape_cast %110 : vector<1x8x8xf32> to vector<8x8xf32>
    %112 = vector.shape_cast %109 : vector<8x8xf32> to vector<1x8x8xf32>
    tpu.vector_store %arg18[%c3_57, %c0_58, %c0_59], %112 {strides = array<i32>} : memref<4x8x8xf32, #tpu.memory_space<vmem>>, vector<1x8x8xf32>,
    %113 = tpu.iota {dimensions = array<i32: 0>} : vector<8x8xi32>
    %114 = vector.broadcast %1 : i32 to vector<8x8xi32>
    %115 = arith.addi %114, %113 : vector<8x8xi32>
    %116 = tpu.iota {dimensions = array<i32: 1>} : vector<8x8xi32>
    %117 = arith.cmpi sge, %115, %116 : vector<8x8xi32>
    %cst_60 = arith.constant 0.000000e+00 : f32
    %118 = vector.broadcast %cst_60 : f32 to vector<8x32xf32>
    %c0_61 = arith.constant 0 : index
    %c0_62 = arith.constant 0 : index
    %119 = vector.load %arg19[%c0_61, %c0_62] : memref<8x32xf32, #tpu.memory_space<vmem>>, vector<8x32xf32>
    tpu.vector_store %arg19[%c0_61, %c0_62], %118 {strides = array<i32>} : memref<8x32xf32, #tpu.memory_space<vmem>>, vector<8x32xf32>,
    %c0_i32 = arith.constant 0 : i32
    %c4_i32 = arith.constant 4 : i32
    %120 = arith.addi %c0_i32, %c4_i32 : i32
    %c1_i32 = arith.constant 1 : i32
    scf.for %arg20 = %c0_i32 to %120 step %c1_i32  : i32 {
      %177 = arith.index_cast %arg20 : i32 to index
      %c0_94 = arith.constant 0 : index
      %c0_95 = arith.constant 0 : index
      %178 = vector.load %arg16[%177, %c0_94, %c0_95] : memref<4x8x8xf32, #tpu.memory_space<vmem>>, vector<1x8x8xf32>
      %179 = vector.shape_cast %178 : vector<1x8x8xf32> to vector<8x8xf32>
      %180 = arith.index_cast %arg20 : i32 to index
      %c0_96 = arith.constant 0 : index
      %c0_97 = arith.constant 0 : index
      %181 = vector.load %arg17[%180, %c0_96, %c0_97] : memref<4x8x8xf32, #tpu.memory_space<vmem>>, vector<1x8x8xf32>
      %182 = vector.shape_cast %181 : vector<1x8x8xf32> to vector<8x8xf32>
      %183 = arith.index_cast %arg20 : i32 to index
      %c0_98 = arith.constant 0 : index
      %c0_99 = arith.constant 0 : index
      %184 = vector.load %arg18[%183, %c0_98, %c0_99] : memref<4x8x8xf32, #tpu.memory_space<vmem>>, vector<1x8x8xf32>
      %185 = vector.shape_cast %184 : vector<1x8x8xf32> to vector<8x8xf32>
      %cst_100 = arith.constant dense<0.000000e+00> : vector<8x8xf32>
      %186 = tpu.matmul %179, %182, %cst_100 {dimension_numbers = #tpu.dot_dimension_numbers<[1], [1], [0], [0], [0, 0, 1, 0], [], []>} : vector<8x8xf32>, vector<8x8xf32>, vector<8x8xf32> -> vector<8x8xf32>
      %cst_101 = arith.constant -1.000000e+30 : f32
      %187 = vector.broadcast %cst_101 : f32 to vector<8x8xf32>
      %188 = arith.select %117, %186, %187 : vector<8x8xi1>, vector<8x8xf32>
      %cst_102 = arith.constant dense<0xFF800000> : vector<8xf32>
      %189 = vector.multi_reduction <maximumf>, %188, %cst_102 [1] : vector<8x8xf32> to vector<8xf32>
      %190 = vector.shape_cast %189 : vector<8xf32> to vector<8x1xf32>
      %191 = vector.broadcast %190 : vector<8x1xf32> to vector<8x8xf32>
      %192 = arith.subf %188, %191 : vector<8x8xf32>
      %193 = math.exp %192 : vector<8x8xf32>
      %cst_103 = arith.constant dense<0.000000e+00> : vector<8xf32>
      %194 = vector.multi_reduction <add>, %193, %cst_103 [1] : vector<8x8xf32> to vector<8xf32>
      %195 = vector.shape_cast %194 : vector<8xf32> to vector<8x1xf32>
      %196 = tpu.reciprocal %195 {approx = true} : vector<8x1xf32> -> vector<8x1xf32>
      %197 = vector.broadcast %196 : vector<8x1xf32> to vector<8x8xf32>
      %198 = arith.mulf %193, %197 : vector<8x8xf32>
      %cst_104 = arith.constant dense<0.000000e+00> : vector<8x8xf32>
      %199 = tpu.matmul %198, %185, %cst_104 {dimension_numbers = #tpu.dot_dimension_numbers<[1], [0], [0], [1], [0, 0, 1, 1], [], []>} : vector<8x8xf32>, vector<8x8xf32>, vector<8x8xf32> -> vector<8x8xf32>
      %c0_105 = arith.constant 0 : index
      %c0_106 = arith.constant 0 : index
      %200 = vector.load %arg19[%c0_105, %c0_106] : memref<8x32xf32, #tpu.memory_space<vmem>>, vector<8x32xf32>
      %201 = arith.index_cast %arg20 : i32 to index
      %c0_107 = arith.constant 0 : index
      %c0_108 = arith.constant 0 : index
      %202 = vector.load %arg5[%201, %c0_107, %c0_108] : memref<4x8x32xf32, #tpu.memory_space<vmem>>, vector<1x8x32xf32>
      %203 = vector.shape_cast %202 : vector<1x8x32xf32> to vector<8x32xf32>
      %cst_109 = arith.constant dense<0.000000e+00> : vector<8x32xf32>
      %204 = tpu.matmul %199, %203, %cst_109 {dimension_numbers = #tpu.dot_dimension_numbers<[1], [0], [0], [1], [0, 0, 1, 1], [], []>} : vector<8x8xf32>, vector<8x32xf32>, vector<8x32xf32> -> vector<8x32xf32>
      %205 = arith.addf %200, %204 : vector<8x32xf32>
      %c0_110 = arith.constant 0 : index
      %c0_111 = arith.constant 0 : index
      %206 = vector.load %arg19[%c0_110, %c0_111] : memref<8x32xf32, #tpu.memory_space<vmem>>, vector<8x32xf32>
      tpu.vector_store %arg19[%c0_110, %c0_111], %205 {strides = array<i32>} : memref<8x32xf32, #tpu.memory_space<vmem>>, vector<8x32xf32>,
    }
    %c4_i32_63 = arith.constant 4 : i32
    %c0_64 = arith.constant 0 : index
    %c0_65 = arith.constant 0 : index
    %121 = vector.load %arg19[%c0_64, %c0_65] : memref<8x32xf32, #tpu.memory_space<vmem>>, vector<8x32xf32>
    %122 = arith.addf %6, %121 : vector<8x32xf32>
    %c0_66 = arith.constant 0 : index
    %c0_67 = arith.constant 0 : index
    %123 = vector.load %arg6[%c0_66, %c0_67] : memref<1x32xf32, #tpu.memory_space<vmem>>, vector<1x32xf32>
    %124 = vector.broadcast %123 : vector<1x32xf32> to vector<8x32xf32>
    %125 = arith.addf %122, %124 : vector<8x32xf32>
    %c0_68 = arith.constant 0 : index
    %c0_69 = arith.constant 0 : index
    %126 = vector.load %arg9[%c0_68, %c0_69] : memref<1x32xf32, #tpu.memory_space<vmem>>, vector<1x32xf32>
    %c0_70 = arith.constant 0 : index
    %c0_71 = arith.constant 0 : index
    %127 = vector.load %arg10[%c0_70, %c0_71] : memref<1x32xf32, #tpu.memory_space<vmem>>, vector<1x32xf32>
    %cst_72 = arith.constant dense<0.000000e+00> : vector<8xf32>
    %128 = vector.multi_reduction <add>, %125, %cst_72 [1] : vector<8x32xf32> to vector<8xf32>
    %129 = vector.shape_cast %128 : vector<8xf32> to vector<8x1xf32>
    %cst_73 = arith.constant 3.200000e+01 : f32
    %130 = vector.broadcast %cst_73 : f32 to vector<8x1xf32>
    %131 = arith.divf %129, %130 : vector<8x1xf32>
    %132 = vector.broadcast %131 : vector<8x1xf32> to vector<8x32xf32>
    %133 = arith.subf %125, %132 : vector<8x32xf32>
    %134 = arith.mulf %133, %133 : vector<8x32xf32>
    %cst_74 = arith.constant dense<0.000000e+00> : vector<8xf32>
    %135 = vector.multi_reduction <add>, %134, %cst_74 [1] : vector<8x32xf32> to vector<8xf32>
    %136 = vector.shape_cast %135 : vector<8xf32> to vector<8x1xf32>
    %cst_75 = arith.constant 3.200000e+01 : f32
    %137 = vector.broadcast %cst_75 : f32 to vector<8x1xf32>
    %138 = arith.divf %136, %137 : vector<8x1xf32>
    %139 = vector.broadcast %131 : vector<8x1xf32> to vector<8x32xf32>
    %140 = arith.subf %125, %139 : vector<8x32xf32>
    %cst_76 = arith.constant 9.99999974E-6 : f32
    %141 = vector.broadcast %cst_76 : f32 to vector<8x1xf32>
    %142 = arith.addf %138, %141 : vector<8x1xf32>
    %143 = math.rsqrt %142 : vector<8x1xf32>
    %144 = vector.broadcast %143 : vector<8x1xf32> to vector<8x32xf32>
    %145 = arith.mulf %140, %144 : vector<8x32xf32>
    %146 = vector.broadcast %126 : vector<1x32xf32> to vector<8x32xf32>
    %147 = arith.mulf %145, %146 : vector<8x32xf32>
    %148 = vector.broadcast %127 : vector<1x32xf32> to vector<8x32xf32>
    %149 = arith.addf %147, %148 : vector<8x32xf32>
    %c0_77 = arith.constant 0 : index
    %c0_78 = arith.constant 0 : index
    %150 = vector.load %arg11[%c0_77, %c0_78] : memref<32x128xf32, #tpu.memory_space<vmem>>, vector<32x128xf32>
    %cst_79 = arith.constant dense<0.000000e+00> : vector<8x128xf32>
    %151 = tpu.matmul %149, %150, %cst_79 {dimension_numbers = #tpu.dot_dimension_numbers<[1], [0], [0], [1], [0, 0, 1, 1], [], []>} : vector<8x32xf32>, vector<32x128xf32>, vector<8x128xf32> -> vector<8x128xf32>
    %c0_80 = arith.constant 0 : index
    %c0_81 = arith.constant 0 : index
    %152 = vector.load %arg12[%c0_80, %c0_81] : memref<1x128xf32, #tpu.memory_space<vmem>>, vector<1x128xf32>
    %153 = vector.broadcast %152 : vector<1x128xf32> to vector<8x128xf32>
    %154 = arith.addf %151, %153 : vector<8x128xf32>
    %cst_82 = arith.constant 5.000000e-01 : f32
    %155 = vector.broadcast %cst_82 : f32 to vector<8x128xf32>
    %156 = arith.mulf %155, %154 : vector<8x128xf32>
    %cst_83 = arith.constant 4.471500e-02 : f32
    %157 = vector.broadcast %cst_83 : f32 to vector<8x128xf32>
    %158 = arith.mulf %157, %154 : vector<8x128xf32>
    %159 = arith.mulf %158, %154 : vector<8x128xf32>
    %160 = arith.mulf %159, %154 : vector<8x128xf32>
    %161 = arith.addf %154, %160 : vector<8x128xf32>
    %cst_84 = arith.constant 0.797884583 : f32
    %162 = vector.broadcast %cst_84 : f32 to vector<8x128xf32>
    %163 = arith.mulf %162, %161 : vector<8x128xf32>
    %164 = math.tanh %163 : vector<8x128xf32>
    %cst_85 = arith.constant 1.000000e+00 : f32
    %165 = vector.broadcast %cst_85 : f32 to vector<8x128xf32>
    %166 = arith.addf %165, %164 : vector<8x128xf32>
    %167 = arith.mulf %156, %166 : vector<8x128xf32>
    %c0_86 = arith.constant 0 : index
    %c0_87 = arith.constant 0 : index
    %168 = vector.load %arg13[%c0_86, %c0_87] : memref<128x32xf32, #tpu.memory_space<vmem>>, vector<128x32xf32>
    %cst_88 = arith.constant dense<0.000000e+00> : vector<8x32xf32>
    %169 = tpu.matmul %167, %168, %cst_88 {dimension_numbers = #tpu.dot_dimension_numbers<[1], [0], [0], [1], [0, 0, 1, 1], [], []>} : vector<8x128xf32>, vector<128x32xf32>, vector<8x32xf32> -> vector<8x32xf32>
    %c0_89 = arith.constant 0 : index
    %c0_90 = arith.constant 0 : index
    %170 = vector.load %arg14[%c0_89, %c0_90] : memref<1x32xf32, #tpu.memory_space<vmem>>, vector<1x32xf32>
    %171 = vector.broadcast %170 : vector<1x32xf32> to vector<8x32xf32>
    %172 = arith.addf %169, %171 : vector<8x32xf32>
    %173 = arith.addf %125, %172 : vector<8x32xf32>
    %c0_91 = arith.constant 0 : index
    %c0_92 = arith.constant 0 : index
    %c0_93 = arith.constant 0 : index
    %174 = vector.load %arg15[%c0_91, %c0_92, %c0_93] : memref<1x8x32xf32, #tpu.memory_space<vmem>>, vector<1x8x32xf32>
    %175 = vector.shape_cast %174 : vector<1x8x32xf32> to vector<8x32xf32>
    %176 = vector.shape_cast %173 : vector<8x32xf32> to vector<1x8x32xf32>
    tpu.vector_store %arg15[%c0_91, %c0_92, %c0_93], %176 {strides = array<i32>} : memref<1x8x32xf32, #tpu.memory_space<vmem>>, vector<1x8x32xf32>,
    return
  }
  func.func @transform_0(%arg0: i32, %arg1: i32) -> (i32, i32, i32) {
    %c0_i32 = arith.constant 0 : i32
    %c0_i32_0 = arith.constant 0 : i32
    %c0_i32_1 = arith.constant 0 : i32
    return %arg0, %c0_i32, %c0_i32_0 : i32, i32, i32
  }
  func.func @transform_1(%arg0: i32, %arg1: i32) -> (i32, i32) {
    %c0_i32 = arith.constant 0 : i32
    %c0_i32_0 = arith.constant 0 : i32
    %c0_i32_1 = arith.constant 0 : i32
    return %c0_i32, %c0_i32_0 : i32, i32
  }
  func.func @transform_2(%arg0: i32, %arg1: i32) -> (i32, i32) {
    %c0_i32 = arith.constant 0 : i32
    %c0_i32_0 = arith.constant 0 : i32
    %c0_i32_1 = arith.constant 0 : i32
    return %c0_i32, %c0_i32_0 : i32, i32
  }
  func.func @transform_3(%arg0: i32, %arg1: i32) -> (i32, i32, i32) {
    %c0_i32 = arith.constant 0 : i32
    %c0_i32_0 = arith.constant 0 : i32
    %c0_i32_1 = arith.constant 0 : i32
    %c0_i32_2 = arith.constant 0 : i32
    return %c0_i32, %c0_i32_0, %c0_i32_1 : i32, i32, i32
  }
  func.func @transform_4(%arg0: i32, %arg1: i32) -> (i32, i32) {
    %c0_i32 = arith.constant 0 : i32
    %c0_i32_0 = arith.constant 0 : i32
    %c0_i32_1 = arith.constant 0 : i32
    return %c0_i32, %c0_i32_0 : i32, i32
  }
  func.func @transform_5(%arg0: i32, %arg1: i32) -> (i32, i32) {
    %c0_i32 = arith.constant 0 : i32
    %c0_i32_0 = arith.constant 0 : i32
    %c0_i32_1 = arith.constant 0 : i32
    return %c0_i32, %c0_i32_0 : i32, i32
  }
  func.func @transform_6(%arg0: i32, %arg1: i32) -> (i32, i32) {
    %c0_i32 = arith.constant 0 : i32
    %c0_i32_0 = arith.constant 0 : i32
    %c0_i32_1 = arith.constant 0 : i32
    return %c0_i32, %c0_i32_0 : i32, i32
  }
  func.func @transform_7(%arg0: i32, %arg1: i32) -> (i32, i32) {
    %c0_i32 = arith.constant 0 : i32
    %c0_i32_0 = arith.constant 0 : i32
    %c0_i32_1 = arith.constant 0 : i32
    return %c0_i32, %c0_i32_0 : i32, i32
  }
  func.func @transform_8(%arg0: i32, %arg1: i32) -> (i32, i32) {
    %c0_i32 = arith.constant 0 : i32
    %c0_i32_0 = arith.constant 0 : i32
    %c0_i32_1 = arith.constant 0 : i32
    return %c0_i32, %c0_i32_0 : i32, i32
  }
  func.func @transform_9(%arg0: i32, %arg1: i32) -> (i32, i32) {
    %c0_i32 = arith.constant 0 : i32
    %c0_i32_0 = arith.constant 0 : i32
    %c0_i32_1 = arith.constant 0 : i32
    return %c0_i32, %c0_i32_0 : i32, i32
  }
  func.func @transform_10(%arg0: i32, %arg1: i32) -> (i32, i32) {
    %c0_i32 = arith.constant 0 : i32
    %c0_i32_0 = arith.constant 0 : i32
    %c0_i32_1 = arith.constant 0 : i32
    return %c0_i32, %c0_i32_0 : i32, i32
  }
  func.func @transform_11(%arg0: i32, %arg1: i32) -> (i32, i32) {
    %c0_i32 = arith.constant 0 : i32
    %c0_i32_0 = arith.constant 0 : i32
    %c0_i32_1 = arith.constant 0 : i32
    return %c0_i32, %c0_i32_0 : i32, i32
  }
  func.func @transform_12(%arg0: i32, %arg1: i32) -> (i32, i32) {
    %c0_i32 = arith.constant 0 : i32
    %c0_i32_0 = arith.constant 0 : i32
    %c0_i32_1 = arith.constant 0 : i32
    return %c0_i32, %c0_i32_0 : i32, i32
  }
  func.func @transform_13(%arg0: i32, %arg1: i32) -> (i32, i32, i32) {
    %c0_i32 = arith.constant 0 : i32
    %c0_i32_0 = arith.constant 0 : i32
    return %arg0, %arg1, %c0_i32 : i32, i32, i32
  }
}

module attributes {stable_mosaic.version = 11 : i64} {
  func.func @block_kernel(%arg0: i32, %arg1: i32, %arg2: memref<1x8x32xf32, #tpu.memory_space<vmem>>, %arg3: memref<32x96xf32, #tpu.memory_space<vmem>>, %arg4: memref<1x96xf32, #tpu.memory_space<vmem>>, %arg5: memref<4x8x32xf32, #tpu.memory_space<vmem>>, %arg6: memref<1x32xf32, #tpu.memory_space<vmem>>, %arg7: memref<1x32xf32, #tpu.memory_space<vmem>>, %arg8: memref<1x32xf32, #tpu.memory_space<vmem>>, %arg9: memref<1x32xf32, #tpu.memory_space<vmem>>, %arg10: memref<1x32xf32, #tpu.memory_space<vmem>>, %arg11: memref<32x128xf32, #tpu.memory_space<vmem>>, %arg12: memref<1x128xf32, #tpu.memory_space<vmem>>, %arg13: memref<128x32xf32, #tpu.memory_space<vmem>>, %arg14: memref<1x32xf32, #tpu.memory_space<vmem>>, %arg15: memref<1x8x32xf32, #tpu.memory_space<vmem>>, %arg16: memref<4x8x8xf32, #tpu.memory_space<vmem>>, %arg17: memref<4x8x8xf32, #tpu.memory_space<vmem>>, %arg18: memref<4x8x8xf32, #tpu.memory_space<vmem>>, %arg19: memref<8x32xf32, #tpu.memory_space<vmem>>) attributes {dimension_semantics = [#tpu.dimension_semantics<parallel>, #tpu.dimension_semantics<parallel>], iteration_bounds = array<i64: 2, 1>, scalar_prefetch = 0 : i64, scratch_operands = 4 : i64, tpu.core_type = #tpu.core_type<tc>, window_params = [{transform_indices = @transform_0, window_bounds = array<i64: 1, 8, 32>}, {pipeline_mode = #tpu.pipeline_mode<synchronous>, transform_indices = @transform_1, window_bounds = array<i64: 32, 96>}, {pipeline_mode = #tpu.pipeline_mode<synchronous>, transform_indices = @transform_2, window_bounds = array<i64: 1, 96>}, {pipeline_mode = #tpu.pipeline_mode<synchronous>, transform_indices = @transform_3, window_bounds = array<i64: 4, 8, 32>}, {pipeline_mode = #tpu.pipeline_mode<synchronous>, transform_indices = @transform_4, window_bounds = array<i64: 1, 32>}, {pipeline_mode = #tpu.pipeline_mode<synchronous>, transform_indices = @transform_5, window_bounds = array<i64: 1, 32>}, {pipeline_mode = #tpu.pipeline_mode<synchronous>, transform_indices = @transform_6, window_bounds = array<i64: 1, 32>}, {pipeline_mode = #tpu.pipeline_mode<synchronous>, transform_indices = @transform_7, window_bounds = array<i64: 1, 32>}, {pipeline_mode = #tpu.pipeline_mode<synchronous>, transform_indices = @transform_8, window_bounds = array<i64: 1, 32>}, {pipeline_mode = #tpu.pipeline_mode<synchronous>, transform_indices = @transform_9, window_bounds = array<i64: 32, 128>}, {pipeline_mode = #tpu.pipeline_mode<synchronous>, transform_indices = @transform_10, window_bounds = array<i64: 1, 128>}, {pipeline_mode = #tpu.pipeline_mode<synchronous>, transform_indices = @transform_11, window_bounds = array<i64: 128, 32>}, {pipeline_mode = #tpu.pipeline_mode<synchronous>, transform_indices = @transform_12, window_bounds = array<i64: 1, 32>}, {transform_indices = @transform_13, window_bounds = array<i64: 1, 8, 32>}]} {
    %c8_i32 = arith.constant 8 : i32
    %0 = arith.muli %arg1, %c8_i32 : i32
    %1 = tpu.assume_multiple %0, 8 : i32
    %c0 = arith.constant 0 : index
    %c0_0 = arith.constant 0 : index
    %c0_1 = arith.constant 0 : index
    %2 = vector.load %arg2[%c0, %c0_0, %c0_1] : memref<1x8x32xf32, #tpu.memory_space<vmem>>, vector<1x8x32xf32>
    %3 = vector.shape_cast %2 : vector<1x8x32xf32> to vector<8x32xf32>
    %c0_2 = arith.constant 0 : index
    %4 = arith.index_cast %1 : i32 to index
    %c0_3 = arith.constant 0 : index
    %5 = vector.load %arg2[%c0_2, %4, %c0_3] : memref<1x8x32xf32, #tpu.memory_space<vmem>>, vector<1x8x32xf32>
    %6 = vector.shape_cast %5 : vector<1x8x32xf32> to vector<8x32xf32>
    %c0_4 = arith.constant 0 : index
    %c0_5 = arith.constant 0 : index
    %7 = vector.load %arg7[%c0_4, %c0_5] : memref<1x32xf32, #tpu.memory_space<vmem>>, vector<1x32xf32>
    %c0_6 = arith.constant 0 : index
    %c0_7 = arith.constant 0 : index
    %8 = vector.load %arg8[%c0_6, %c0_7] : memref<1x32xf32, #tpu.memory_space<vmem>>, vector<1x32xf32>
    %cst = arith.constant dense<0.000000e+00> : vector<8xf32>
    %9 = vector.multi_reduction <add>, %3, %cst [1] : vector<8x32xf32> to vector<8xf32>
    %10 = vector.shape_cast %9 : vector<8xf32> to vector<8x1xf32>
    %cst_8 = arith.constant 3.200000e+01 : f32
    %11 = vector.broadcast %cst_8 : f32 to vector<8x1xf32>
    %12 = arith.divf %10, %11 : vector<8x1xf32>
    %13 = vector.broadcast %12 : vector<8x1xf32> to vector<8x32xf32>
    %14 = arith.subf %3, %13 : vector<8x32xf32>
    %15 = arith.mulf %14, %14 : vector<8x32xf32>
    %cst_9 = arith.constant dense<0.000000e+00> : vector<8xf32>
    %16 = vector.multi_reduction <add>, %15, %cst_9 [1] : vector<8x32xf32> to vector<8xf32>
    %17 = vector.shape_cast %16 : vector<8xf32> to vector<8x1xf32>
    %cst_10 = arith.constant 3.200000e+01 : f32
    %18 = vector.broadcast %cst_10 : f32 to vector<8x1xf32>
    %19 = arith.divf %17, %18 : vector<8x1xf32>
    %20 = vector.broadcast %12 : vector<8x1xf32> to vector<8x32xf32>
    %21 = arith.subf %3, %20 : vector<8x32xf32>
    %cst_11 = arith.constant 9.99999974E-6 : f32
    %22 = vector.broadcast %cst_11 : f32 to vector<8x1xf32>
    %23 = arith.addf %19, %22 : vector<8x1xf32>
    %24 = math.rsqrt %23 : vector<8x1xf32>
    %25 = vector.broadcast %24 : vector<8x1xf32> to vector<8x32xf32>
    %26 = arith.mulf %21, %25 : vector<8x32xf32>
    %27 = vector.broadcast %7 : vector<1x32xf32> to vector<8x32xf32>
    %28 = arith.mulf %26, %27 : vector<8x32xf32>
    %29 = vector.broadcast %8 : vector<1x32xf32> to vector<8x32xf32>
    %30 = arith.addf %28, %29 : vector<8x32xf32>
    %cst_12 = arith.constant dense<0.000000e+00> : vector<8xf32>
    %31 = vector.multi_reduction <add>, %6, %cst_12 [1] : vector<8x32xf32> to vector<8xf32>
    %32 = vector.shape_cast %31 : vector<8xf32> to vector<8x1xf32>
    %cst_13 = arith.constant 3.200000e+01 : f32
    %33 = vector.broadcast %cst_13 : f32 to vector<8x1xf32>
    %34 = arith.divf %32, %33 : vector<8x1xf32>
    %35 = vector.broadcast %34 : vector<8x1xf32> to vector<8x32xf32>
    %36 = arith.subf %6, %35 : vector<8x32xf32>
    %37 = arith.mulf %36, %36 : vector<8x32xf32>
    %cst_14 = arith.constant dense<0.000000e+00> : vector<8xf32>
    %38 = vector.multi_reduction <add>, %37, %cst_14 [1] : vector<8x32xf32> to vector<8xf32>
    %39 = vector.shape_cast %38 : vector<8xf32> to vector<8x1xf32>
    %cst_15 = arith.constant 3.200000e+01 : f32
    %40 = vector.broadcast %cst_15 : f32 to vector<8x1xf32>
    %41 = arith.divf %39, %40 : vector<8x1xf32>
    %42 = vector.broadcast %34 : vector<8x1xf32> to vector<8x32xf32>
    %43 = arith.subf %6, %42 : vector<8x32xf32>
    %cst_16 = arith.constant 9.99999974E-6 : f32
    %44 = vector.broadcast %cst_16 : f32 to vector<8x1xf32>
    %45 = arith.addf %41, %44 : vector<8x1xf32>
    %46 = math.rsqrt %45 : vector<8x1xf32>
    %47 = vector.broadcast %46 : vector<8x1xf32> to vector<8x32xf32>
    %48 = arith.mulf %43, %47 : vector<8x32xf32>
    %49 = vector.broadcast %7 : vector<1x32xf32> to vector<8x32xf32>
    %50 = arith.mulf %48, %49 : vector<8x32xf32>
    %51 = vector.broadcast %8 : vector<1x32xf32> to vector<8x32xf32>
    %52 = arith.addf %50, %51 : vector<8x32xf32>
    %c0_17 = arith.constant 0 : index
    %c32 = arith.constant 32 : index
    %53 = vector.load %arg3[%c0_17, %c32] : memref<32x96xf32, #tpu.memory_space<vmem>>, vector<32x64xf32>
    %cst_18 = arith.constant dense<0.000000e+00> : vector<8x64xf32>
    %54 = tpu.matmul %30, %53, %cst_18 {dimension_numbers = #tpu.dot_dimension_numbers<[1], [0], [0], [1], [0, 0, 1, 1], [], []>} : vector<8x32xf32>, vector<32x64xf32>, vector<8x64xf32> -> vector<8x64xf32>
    %c0_19 = arith.constant 0 : index
    %c32_20 = arith.constant 32 : index
    %55 = vector.load %arg4[%c0_19, %c32_20] : memref<1x96xf32, #tpu.memory_space<vmem>>, vector<1x64xf32>
    %56 = vector.broadcast %55 : vector<1x64xf32> to vector<8x64xf32>
    %57 = arith.addf %54, %56 : vector<8x64xf32>
    %c0_21 = arith.constant 0 : index
    %c0_22 = arith.constant 0 : index
    %58 = vector.load %arg3[%c0_21, %c0_22] : memref<32x96xf32, #tpu.memory_space<vmem>>, vector<32x32xf32>
    %cst_23 = arith.constant dense<0.000000e+00> : vector<8x32xf32>
    %59 = tpu.matmul %52, %58, %cst_23 {dimension_numbers = #tpu.dot_dimension_numbers<[1], [0], [0], [1], [0, 0, 1, 1], [], []>} : vector<8x32xf32>, vector<32x32xf32>, vector<8x32xf32> -> vector<8x32xf32>
    %c0_24 = arith.constant 0 : index
    %c0_25 = arith.constant 0 : index
    %60 = vector.load %arg4[%c0_24, %c0_25] : memref<1x96xf32, #tpu.memory_space<vmem>>, vector<1x32xf32>
    %61 = vector.broadcast %60 : vector<1x32xf32> to vector<8x32xf32>
    %62 = arith.addf %59, %61 : vector<8x32xf32>
    %cst_26 = arith.constant 0.353553385 : f32
    %63 = vector.broadcast %cst_26 : f32 to vector<8x32xf32>
    %64 = arith.mulf %62, %63 : vector<8x32xf32>
    %65 = vector.extract_strided_slice %64 {offsets = [0, 0], sizes = [8, 8], strides = [1, 1]} : vector<8x32xf32> to vector<8x8xf32>
    %c0_27 = arith.constant 0 : index
    %c0_28 = arith.constant 0 : index
    %c0_29 = arith.constant 0 : index
    %66 = vector.load %arg16[%c0_27, %c0_28, %c0_29] : memref<4x8x8xf32, #tpu.memory_space<vmem>>, vector<1x8x8xf32>
    %67 = vector.shape_cast %66 : vector<1x8x8xf32> to vector<8x8xf32>
    %68 = vector.shape_cast %65 : vector<8x8xf32> to vector<1x8x8xf32>
    tpu.vector_store %arg16[%c0_27, %c0_28, %c0_29], %68 {strides = array<i32>} : memref<4x8x8xf32, #tpu.memory_space<vmem>>, vector<1x8x8xf32>,
    %69 = vector.extract_strided_slice %57 {offsets = [0, 0], sizes = [8, 8], strides = [1, 1]} : vector<8x64xf32> to vector<8x8xf32>
    %c0_30 = arith.constant 0 : index
    %c0_31 = arith.constant 0 : index
    %c0_32 = arith.constant 0 : index
    %70 = vector.load %arg17[%c0_30, %c0_31, %c0_32] : memref<4x8x8xf32, #tpu.memory_space<vmem>>, vector<1x8x8xf32>
    %71 = vector.shape_cast %70 : vector<1x8x8xf32> to vector<8x8xf32>
    %72 = vector.shape_cast %69 : vector<8x8xf32> to vector<1x8x8xf32>
    tpu.vector_store %arg17[%c0_30, %c0_31, %c0_32], %72 {strides = array<i32>} : memref<4x8x8xf32, #tpu.memory_space<vmem>>, vector<1x8x8xf32>,
    %73 = vector.extract_strided_slice %57 {offsets = [0, 32], sizes = [8, 8], strides = [1, 1]} : vector<8x64xf32> to vector<8x8xf32>
    %c0_33 = arith.constant 0 : index
    %c0_34 = arith.constant 0 : index
    %c0_35 = arith.constant 0 : index
    %74 = vector.load %arg18[%c0_33, %c0_34, %c0_35] : memref<4x8x8xf32, #tpu.memory_space<vmem>>, vector<1x8x8xf32>
    %75 = vector.shape_cast %74 : vector<1x8x8xf32> to vector<8x8xf32>
    %76 = vector.shape_cast %73 : vector<8x8xf32> to vector<1x8x8xf32>
    tpu.vector_store %arg18[%c0_33, %c0_34, %c0_35], %76 {strides = array<i32>} : memref<4x8x8xf32, #tpu.memory_space<vmem>>, vector<1x8x8xf32>,
    %77 = vector.extract_strided_slice %64 {offsets = [0, 8], sizes = [8, 8], strides = [1, 1]} : vector<8x32xf32> to vector<8x8xf32>
    %c1 = arith.constant 1 : index
    %c0_36 = arith.constant 0 : index
    %c0_37 = arith.constant 0 : index
    %78 = vector.load %arg16[%c1, %c0_36, %c0_37] : memref<4x8x8xf32, #tpu.memory_space<vmem>>, vector<1x8x8xf32>
    %79 = vector.shape_cast %78 : vector<1x8x8xf32> to vector<8x8xf32>
    %80 = vector.shape_cast %77 : vector<8x8xf32> to vector<1x8x8xf32>
    tpu.vector_store %arg16[%c1, %c0_36, %c0_37], %80 {strides = array<i32>} : memref<4x8x8xf32, #tpu.memory_space<vmem>>, vector<1x8x8xf32>,
    %81 = vector.extract_strided_slice %57 {offsets = [0, 8], sizes = [8, 8], strides = [1, 1]} : vector<8x64xf32> to vector<8x8xf32>
    %c1_38 = arith.constant 1 : index
    %c0_39 = arith.constant 0 : index
    %c0_40 = arith.constant 0 : index
    %82 = vector.load %arg17[%c1_38, %c0_39, %c0_40] : memref<4x8x8xf32, #tpu.memory_space<vmem>>, vector<1x8x8xf32>
    %83 = vector.shape_cast %82 : vector<1x8x8xf32> to vector<8x8xf32>
    %84 = vector.shape_cast %81 : vector<8x8xf32> to vector<1x8x8xf32>
    tpu.vector_store %arg17[%c1_38, %c0_39, %c0_40], %84 {strides = array<i32>} : memref<4x8x8xf32, #tpu.memory_space<vmem>>, vector<1x8x8xf32>,
    %85 = vector.extract_strided_slice %57 {offsets = [0, 40], sizes = [8, 8], strides = [1, 1]} : vector<8x64xf32> to vector<8x8xf32>
    %c1_41 = arith.constant 1 : index
    %c0_42 = arith.constant 0 : index
    %c0_43 = arith.constant 0 : index
    %86 = vector.load %arg18[%c1_41, %c0_42, %c0_43] : memref<4x8x8xf32, #tpu.memory_space<vmem>>, vector<1x8x8xf32>
    %87 = vector.shape_cast %86 : vector<1x8x8xf32> to vector<8x8xf32>
    %88 = vector.shape_cast %85 : vector<8x8xf32> to vector<1x8x8xf32>
    tpu.vector_store %arg18[%c1_41, %c0_42, %c0_43], %88 {strides = array<i32>} : memref<4x8x8xf32, #tpu.memory_space<vmem>>, vector<1x8x8xf32>,
    %89 = vector.extract_strided_slice %64 {offsets = [0, 16], sizes = [8, 8], strides = [1, 1]} : vector<8x32xf32> to vector<8x8xf32>
    %c2 = arith.constant 2 : index
    %c0_44 = arith.constant 0 : index
    %c0_45 = arith.constant 0 : index
    %90 = vector.load %arg16[%c2, %c0_44, %c0_45] : memref<4x8x8xf32, #tpu.memory_space<vmem>>, vector<1x8x8xf32>
    %91 = vector.shape_cast %90 : vector<1x8x8xf32> to vector<8x8xf32>
    %92 = vector.shape_cast %89 : vector<8x8xf32> to vector<1x8x8xf32>
    tpu.vector_store %arg16[%c2, %c0_44, %c0_45], %92 {strides = array<i32>} : memref<4x8x8xf32, #tpu.memory_space<vmem>>, vector<1x8x8xf32>,
    %93 = vector.extract_strided_slice %57 {offsets = [0, 16], sizes = [8, 8], strides = [1, 1]} : vector<8x64xf32> to vector<8x8xf32>
    %c2_46 = arith.constant 2 : index
    %c0_47 = arith.constant 0 : index
    %c0_48 = arith.constant 0 : index
    %94 = vector.load %arg17[%c2_46, %c0_47, %c0_48] : memref<4x8x8xf32, #tpu.memory_space<vmem>>, vector<1x8x8xf32>
    %95 = vector.shape_cast %94 : vector<1x8x8xf32> to vector<8x8xf32>
    %96 = vector.shape_cast %93 : vector<8x8xf32> to vector<1x8x8xf32>
    tpu.vector_store %arg17[%c2_46, %c0_47, %c0_48], %96 {strides = array<i32>} : memref<4x8x8xf32, #tpu.memory_space<vmem>>, vector<1x8x8xf32>,
    %97 = vector.extract_strided_slice %57 {offsets = [0, 48], sizes = [8, 8], strides = [1, 1]} : vector<8x64xf32> to vector<8x8xf32>
    %c2_49 = arith.constant 2 : index
    %c0_50 = arith.constant 0 : index
    %c0_51 = arith.constant 0 : index
    %98 = vector.load %arg18[%c2_49, %c0_50, %c0_51] : memref<4x8x8xf32, #tpu.memory_space<vmem>>, vector<1x8x8xf32>
    %99 = vector.shape_cast %98 : vector<1x8x8xf32> to vector<8x8xf32>
    %100 = vector.shape_cast %97 : vector<8x8xf32> to vector<1x8x8xf32>
    tpu.vector_store %arg18[%c2_49, %c0_50, %c0_51], %100 {strides = array<i32>} : memref<4x8x8xf32, #tpu.memory_space<vmem>>, vector<1x8x8xf32>,
    %101 = vector.extract_strided_slice %64 {offsets = [0, 24], sizes = [8, 8], strides = [1, 1]} : vector<8x32xf32> to vector<8x8xf32>
    %c3 = arith.constant 3 : index
    %c0_52 = arith.constant 0 : index
    %c0_53 = arith.constant 0 : index
    %102 = vector.load %arg16[%c3, %c0_52, %c0_53] : memref<4x8x8xf32, #tpu.memory_space<vmem>>, vector<1x8x8xf32>
    %103 = vector.shape_cast %102 : vector<1x8x8xf32> to vector<8x8xf32>
    %104 = vector.shape_cast %101 : vector<8x8xf32> to vector<1x8x8xf32>
    tpu.vector_store %arg16[%c3, %c0_52, %c0_53], %104 {strides = array<i32>} : memref<4x8x8xf32, #tpu.memory_space<vmem>>, vector<1x8x8xf32>,
    %105 = vector.extract_strided_slice %57 {offsets = [0, 24], sizes = [8, 8], strides = [1, 1]} : vector<8x64xf32> to vector<8x8xf32>
    %c3_54 = arith.constant 3 : index
    %c0_55 = arith.constant 0 : index
    %c0_56 = arith.constant 0 : index
    %106 = vector.load %arg17[%c3_54, %c0_55, %c0_56] : memref<4x8x8xf32, #tpu.memory_space<vmem>>, vector<1x8x8xf32>
    %107 = vector.shape_cast %106 : vector<1x8x8xf32> to vector<8x8xf32>
    %108 = vector.shape_cast %105 : vector<8x8xf32> to vector<1x8x8xf32>
    tpu.vector_store %arg17[%c3_54, %c0_55, %c0_56], %108 {strides = array<i32>} : memref<4x8x8xf32, #tpu.memory_space<vmem>>, vector<1x8x8xf32>,
    %109 = vector.extract_strided_slice %57 {offsets = [0, 56], sizes = [8, 8], strides = [1, 1]} : vector<8x64xf32> to vector<8x8xf32>
    %c3_57 = arith.constant 3 : index
    %c0_58 = arith.constant 0 : index
    %c0_59 = arith.constant 0 : index
    %110 = vector.load %arg18[%c3_57, %c0_58, %c0_59] : memref<4x8x8xf32, #tpu.memory_space<vmem>>, vector<1x8x8xf32>
    %111 = vector.shape_cast %110 : vector<1x8x8xf32> to vector<8x8xf32>
    %112 = vector.shape_cast %109 : vector<8x8xf32> to vector<1x8x8xf32>
    tpu.vector_store %arg18[%c3_57, %c0_58, %c0_59], %112 {strides = array<i32>} : memref<4x8x8xf32, #tpu.memory_space<vmem>>, vector<1x8x8xf32>,
    %113 = tpu.iota {dimensions = array<i32: 0>} : vector<8x8xi32>
    %114 = vector.broadcast %1 : i32 to vector<8x8xi32>
    %115 = arith.addi %114, %113 : vector<8x8xi32>
    %116 = tpu.iota {dimensions = array<i32: 1>} : vector<8x8xi32>
    %117 = arith.cmpi sge, %115, %116 : vector<8x8xi32>
    %cst_60 = arith.constant 0.000000e+00 : f32
    %118 = vector.broadcast %cst_60 : f32 to vector<8x32xf32>
    %c0_61 = arith.constant 0 : index
    %c0_62 = arith.constant 0 : index
    %119 = vector.load %arg19[%c0_61, %c0_62] : memref<8x32xf32, #tpu.memory_space<vmem>>, vector<8x32xf32>
    tpu.vector_store %arg19[%c0_61, %c0_62], %118 {strides = array<i32>} : memref<8x32xf32, #tpu.memory_space<vmem>>, vector<8x32xf32>,
    %c0_i32 = arith.constant 0 : i32
    %c4_i32 = arith.constant 4 : i32
    %120 = arith.addi %c0_i32, %c4_i32 : i32
    %c1_i32 = arith.constant 1 : i32
    scf.for %arg20 = %c0_i32 to %120 step %c1_i32  : i32 {
      %177 = arith.index_cast %arg20 : i32 to index
      %c0_94 = arith.constant 0 : index
      %c0_95 = arith.constant 0 : index
      %178 = vector.load %arg16[%177, %c0_94, %c0_95] : memref<4x8x8xf32, #tpu.memory_space<vmem>>, vector<1x8x8xf32>
      %179 = vector.shape_cast %178 : vector<1x8x8xf32> to vector<8x8xf32>
      %180 = arith.index_cast %arg20 : i32 to index
      %c0_96 = arith.constant 0 : index
      %c0_97 = arith.constant 0 : index
      %181 = vector.load %arg17[%180, %c0_96, %c0_97] : memref<4x8x8xf32, #tpu.memory_space<vmem>>, vector<1x8x8xf32>
      %182 = vector.shape_cast %181 : vector<1x8x8xf32> to vector<8x8xf32>
      %183 = arith.index_cast %arg20 : i32 to index
      %c0_98 = arith.constant 0 : index
      %c0_99 = arith.constant 0 : index
      %184 = vector.load %arg18[%183, %c0_98, %c0_99] : memref<4x8x8xf32, #tpu.memory_space<vmem>>, vector<1x8x8xf32>
      %185 = vector.shape_cast %184 : vector<1x8x8xf32> to vector<8x8xf32>
      %cst_100 = arith.constant dense<0.000000e+00> : vector<8x8xf32>
      %186 = tpu.matmul %179, %182, %cst_100 {dimension_numbers = #tpu.dot_dimension_numbers<[1], [1], [0], [0], [0, 0, 1, 0], [], []>} : vector<8x8xf32>, vector<8x8xf32>, vector<8x8xf32> -> vector<8x8xf32>
      %cst_101 = arith.constant -1.000000e+30 : f32
      %187 = vector.broadcast %cst_101 : f32 to vector<8x8xf32>
      %188 = arith.select %117, %186, %187 : vector<8x8xi1>, vector<8x8xf32>
      %cst_102 = arith.constant dense<0xFF800000> : vector<8xf32>
      %189 = vector.multi_reduction <maximumf>, %188, %cst_102 [1] : vector<8x8xf32> to vector<8xf32>
      %190 = vector.shape_cast %189 : vector<8xf32> to vector<8x1xf32>
      %191 = vector.broadcast %190 : vector<8x1xf32> to vector<8x8xf32>
      %192 = arith.subf %188, %191 : vector<8x8xf32>
      %193 = math.exp %192 : vector<8x8xf32>
      %cst_103 = arith.constant dense<0.000000e+00> : vector<8xf32>
      %194 = vector.multi_reduction <add>, %193, %cst_103 [1] : vector<8x8xf32> to vector<8xf32>
      %195 = vector.shape_cast %194 : vector<8xf32> to vector<8x1xf32>
      %196 = tpu.reciprocal %195 {approx = true} : vector<8x1xf32> -> vector<8x1xf32>
      %197 = vector.broadcast %196 : vector<8x1xf32> to vector<8x8xf32>
      %198 = arith.mulf %193, %197 : vector<8x8xf32>
      %cst_104 = arith.constant dense<0.000000e+00> : vector<8x8xf32>
      %199 = tpu.matmul %198, %185, %cst_104 {dimension_numbers = #tpu.dot_dimension_numbers<[1], [0], [0], [1], [0, 0, 1, 1], [], []>} : vector<8x8xf32>, vector<8x8xf32>, vector<8x8xf32> -> vector<8x8xf32>
      %c0_105 = arith.constant 0 : index
      %c0_106 = arith.constant 0 : index
      %200 = vector.load %arg19[%c0_105, %c0_106] : memref<8x32xf32, #tpu.memory_space<vmem>>, vector<8x32xf32>
      %201 = arith.index_cast %arg20 : i32 to index
      %c0_107 = arith.constant 0 : index
      %c0_108 = arith.constant 0 : index
      %202 = vector.load %arg5[%201, %c0_107, %c0_108] : memref<4x8x32xf32, #tpu.memory_space<vmem>>, vector<1x8x32xf32>
      %203 = vector.shape_cast %202 : vector<1x8x32xf32> to vector<8x32xf32>
      %cst_109 = arith.constant dense<0.000000e+00> : vector<8x32xf32>
      %204 = tpu.matmul %199, %203, %cst_109 {dimension_numbers = #tpu.dot_dimension_numbers<[1], [0], [0], [1], [0, 0, 1, 1], [], []>} : vector<8x8xf32>, vector<8x32xf32>, vector<8x32xf32> -> vector<8x32xf32>
      %205 = arith.addf %200, %204 : vector<8x32xf32>
      %c0_110 = arith.constant 0 : index
      %c0_111 = arith.constant 0 : index
      %206 = vector.load %arg19[%c0_110, %c0_111] : memref<8x32xf32, #tpu.memory_space<vmem>>, vector<8x32xf32>
      tpu.vector_store %arg19[%c0_110, %c0_111], %205 {strides = array<i32>} : memref<8x32xf32, #tpu.memory_space<vmem>>, vector<8x32xf32>,
    }
    %c4_i32_63 = arith.constant 4 : i32
    %c0_64 = arith.constant 0 : index
    %c0_65 = arith.constant 0 : index
    %121 = vector.load %arg19[%c0_64, %c0_65] : memref<8x32xf32, #tpu.memory_space<vmem>>, vector<8x32xf32>
    %122 = arith.addf %6, %121 : vector<8x32xf32>
    %c0_66 = arith.constant 0 : index
    %c0_67 = arith.constant 0 : index
    %123 = vector.load %arg6[%c0_66, %c0_67] : memref<1x32xf32, #tpu.memory_space<vmem>>, vector<1x32xf32>
    %124 = vector.broadcast %123 : vector<1x32xf32> to vector<8x32xf32>
    %125 = arith.addf %122, %124 : vector<8x32xf32>
    %c0_68 = arith.constant 0 : index
    %c0_69 = arith.constant 0 : index
    %126 = vector.load %arg9[%c0_68, %c0_69] : memref<1x32xf32, #tpu.memory_space<vmem>>, vector<1x32xf32>
    %c0_70 = arith.constant 0 : index
    %c0_71 = arith.constant 0 : index
    %127 = vector.load %arg10[%c0_70, %c0_71] : memref<1x32xf32, #tpu.memory_space<vmem>>, vector<1x32xf32>
    %cst_72 = arith.constant dense<0.000000e+00> : vector<8xf32>
    %128 = vector.multi_reduction <add>, %125, %cst_72 [1] : vector<8x32xf32> to vector<8xf32>
    %129 = vector.shape_cast %128 : vector<8xf32> to vector<8x1xf32>
    %cst_73 = arith.constant 3.200000e+01 : f32
    %130 = vector.broadcast %cst_73 : f32 to vector<8x1xf32>
    %131 = arith.divf %129, %130 : vector<8x1xf32>
    %132 = vector.broadcast %131 : vector<8x1xf32> to vector<8x32xf32>
    %133 = arith.subf %125, %132 : vector<8x32xf32>
    %134 = arith.mulf %133, %133 : vector<8x32xf32>
    %cst_74 = arith.constant dense<0.000000e+00> : vector<8xf32>
    %135 = vector.multi_reduction <add>, %134, %cst_74 [1] : vector<8x32xf32> to vector<8xf32>
    %136 = vector.shape_cast %135 : vector<8xf32> to vector<8x1xf32>
    %cst_75 = arith.constant 3.200000e+01 : f32
    %137 = vector.broadcast %cst_75 : f32 to vector<8x1xf32>
    %138 = arith.divf %136, %137 : vector<8x1xf32>
    %139 = vector.broadcast %131 : vector<8x1xf32> to vector<8x32xf32>
    %140 = arith.subf %125, %139 : vector<8x32xf32>
    %cst_76 = arith.constant 9.99999974E-6 : f32
    %141 = vector.broadcast %cst_76 : f32 to vector<8x1xf32>
    %142 = arith.addf %138, %141 : vector<8x1xf32>
    %143 = math.rsqrt %142 : vector<8x1xf32>
    %144 = vector.broadcast %143 : vector<8x1xf32> to vector<8x32xf32>
    %145 = arith.mulf %140, %144 : vector<8x32xf32>
    %146 = vector.broadcast %126 : vector<1x32xf32> to vector<8x32xf32>
    %147 = arith.mulf %145, %146 : vector<8x32xf32>
    %148 = vector.broadcast %127 : vector<1x32xf32> to vector<8x32xf32>
    %149 = arith.addf %147, %148 : vector<8x32xf32>
    %c0_77 = arith.constant 0 : index
    %c0_78 = arith.constant 0 : index
    %150 = vector.load %arg11[%c0_77, %c0_78] : memref<32x128xf32, #tpu.memory_space<vmem>>, vector<32x128xf32>
    %cst_79 = arith.constant dense<0.000000e+00> : vector<8x128xf32>
    %151 = tpu.matmul %149, %150, %cst_79 {dimension_numbers = #tpu.dot_dimension_numbers<[1], [0], [0], [1], [0, 0, 1, 1], [], []>} : vector<8x32xf32>, vector<32x128xf32>, vector<8x128xf32> -> vector<8x128xf32>
    %c0_80 = arith.constant 0 : index
    %c0_81 = arith.constant 0 : index
    %152 = vector.load %arg12[%c0_80, %c0_81] : memref<1x128xf32, #tpu.memory_space<vmem>>, vector<1x128xf32>
    %153 = vector.broadcast %152 : vector<1x128xf32> to vector<8x128xf32>
    %154 = arith.addf %151, %153 : vector<8x128xf32>
    %cst_82 = arith.constant 5.000000e-01 : f32
    %155 = vector.broadcast %cst_82 : f32 to vector<8x128xf32>
    %156 = arith.mulf %155, %154 : vector<8x128xf32>
    %cst_83 = arith.constant 4.471500e-02 : f32
    %157 = vector.broadcast %cst_83 : f32 to vector<8x128xf32>
    %158 = arith.mulf %157, %154 : vector<8x128xf32>
    %159 = arith.mulf %158, %154 : vector<8x128xf32>
    %160 = arith.mulf %159, %154 : vector<8x128xf32>
    %161 = arith.addf %154, %160 : vector<8x128xf32>
    %cst_84 = arith.constant 0.797884583 : f32
    %162 = vector.broadcast %cst_84 : f32 to vector<8x128xf32>
    %163 = arith.mulf %162, %161 : vector<8x128xf32>
    %164 = math.tanh %163 : vector<8x128xf32>
    %cst_85 = arith.constant 1.000000e+00 : f32
    %165 = vector.broadcast %cst_85 : f32 to vector<8x128xf32>
    %166 = arith.addf %165, %164 : vector<8x128xf32>
    %167 = arith.mulf %156, %166 : vector<8x128xf32>
    %c0_86 = arith.constant 0 : index
    %c0_87 = arith.constant 0 : index
    %168 = vector.load %arg13[%c0_86, %c0_87] : memref<128x32xf32, #tpu.memory_space<vmem>>, vector<128x32xf32>
    %cst_88 = arith.constant dense<0.000000e+00> : vector<8x32xf32>
    %169 = tpu.matmul %167, %168, %cst_88 {dimension_numbers = #tpu.dot_dimension_numbers<[1], [0], [0], [1], [0, 0, 1, 1], [], []>} : vector<8x128xf32>, vector<128x32xf32>, vector<8x32xf32> -> vector<8x32xf32>
    %c0_89 = arith.constant 0 : index
    %c0_90 = arith.constant 0 : index
    %170 = vector.load %arg14[%c0_89, %c0_90] : memref<1x32xf32, #tpu.memory_space<vmem>>, vector<1x32xf32>
    %171 = vector.broadcast %170 : vector<1x32xf32> to vector<8x32xf32>
    %172 = arith.addf %169, %171 : vector<8x32xf32>
    %173 = arith.addf %125, %172 : vector<8x32xf32>
    %c0_91 = arith.constant 0 : index
    %c0_92 = arith.constant 0 : index
    %c0_93 = arith.constant 0 : index
    %174 = vector.load %arg15[%c0_91, %c0_92, %c0_93] : memref<1x8x32xf32, #tpu.memory_space<vmem>>, vector<1x8x32xf32>
    %175 = vector.shape_cast %174 : vector<1x8x32xf32> to vector<8x32xf32>
    %176 = vector.shape_cast %173 : vector<8x32xf32> to vector<1x8x32xf32>
    tpu.vector_store %arg15[%c0_91, %c0_92, %c0_93], %176 {strides = array<i32>} : memref<1x8x32xf32, #tpu.memory_space<vmem>>, vector<1x8x32xf32>,
    return
  }
  func.func @transform_0(%arg0: i32, %arg1: i32) -> (i32, i32, i32) {
    %c0_i32 = arith.constant 0 : i32
    %c0_i32_0 = arith.constant 0 : i32
    %c0_i32_1 = arith.constant 0 : i32
    return %arg0, %c0_i32, %c0_i32_0 : i32, i32, i32
  }
  func.func @transform_1(%arg0: i32, %arg1: i32) -> (i32, i32) {
    %c0_i32 = arith.constant 0 : i32
    %c0_i32_0 = arith.constant 0 : i32
    %c0_i32_1 = arith.constant 0 : i32
    return %c0_i32, %c0_i32_0 : i32, i32
  }
  func.func @transform_2(%arg0: i32, %arg1: i32) -> (i32, i32) {
    %c0_i32 = arith.constant 0 : i32
    %c0_i32_0 = arith.constant 0 : i32
    %c0_i32_1 = arith.constant 0 : i32
    return %c0_i32, %c0_i32_0 : i32, i32
  }
  func.func @transform_3(%arg0: i32, %arg1: i32) -> (i32, i32, i32) {
    %c0_i32 = arith.constant 0 : i32
    %c0_i32_0 = arith.constant 0 : i32
    %c0_i32_1 = arith.constant 0 : i32
    %c0_i32_2 = arith.constant 0 : i32
    return %c0_i32, %c0_i32_0, %c0_i32_1 : i32, i32, i32
  }
  func.func @transform_4(%arg0: i32, %arg1: i32) -> (i32, i32) {
    %c0_i32 = arith.constant 0 : i32
    %c0_i32_0 = arith.constant 0 : i32
    %c0_i32_1 = arith.constant 0 : i32
    return %c0_i32, %c0_i32_0 : i32, i32
  }
  func.func @transform_5(%arg0: i32, %arg1: i32) -> (i32, i32) {
    %c0_i32 = arith.constant 0 : i32
    %c0_i32_0 = arith.constant 0 : i32
    %c0_i32_1 = arith.constant 0 : i32
    return %c0_i32, %c0_i32_0 : i32, i32
  }
  func.func @transform_6(%arg0: i32, %arg1: i32) -> (i32, i32) {
    %c0_i32 = arith.constant 0 : i32
    %c0_i32_0 = arith.constant 0 : i32
    %c0_i32_1 = arith.constant 0 : i32
    return %c0_i32, %c0_i32_0 : i32, i32
  }
  func.func @transform_7(%arg0: i32, %arg1: i32) -> (i32, i32) {
    %c0_i32 = arith.constant 0 : i32
    %c0_i32_0 = arith.constant 0 : i32
    %c0_i32_1 = arith.constant 0 : i32
    return %c0_i32, %c0_i32_0 : i32, i32
  }
  func.func @transform_8(%arg0: i32, %arg1: i32) -> (i32, i32) {
    %c0_i32 = arith.constant 0 : i32
    %c0_i32_0 = arith.constant 0 : i32
    %c0_i32_1 = arith.constant 0 : i32
    return %c0_i32, %c0_i32_0 : i32, i32
  }
  func.func @transform_9(%arg0: i32, %arg1: i32) -> (i32, i32) {
    %c0_i32 = arith.constant 0 : i32
    %c0_i32_0 = arith.constant 0 : i32
    %c0_i32_1 = arith.constant 0 : i32
    return %c0_i32, %c0_i32_0 : i32, i32
  }
  func.func @transform_10(%arg0: i32, %arg1: i32) -> (i32, i32) {
    %c0_i32 = arith.constant 0 : i32
    %c0_i32_0 = arith.constant 0 : i32
    %c0_i32_1 = arith.constant 0 : i32
    return %c0_i32, %c0_i32_0 : i32, i32
  }
  func.func @transform_11(%arg0: i32, %arg1: i32) -> (i32, i32) {
    %c0_i32 = arith.constant 0 : i32
    %c0_i32_0 = arith.constant 0 : i32
    %c0_i32_1 = arith.constant 0 : i32
    return %c0_i32, %c0_i32_0 : i32, i32
  }
  func.func @transform_12(%arg0: i32, %arg1: i32) -> (i32, i32) {
    %c0_i32 = arith.constant 0 : i32
    %c0_i32_0 = arith.constant 0 : i32
    %c0_i32_1 = arith.constant 0 : i32
    return %c0_i32, %c0_i32_0 : i32, i32
  }
  func.func @transform_13(%arg0: i32, %arg1: i32) -> (i32, i32, i32) {
    %c0_i32 = arith.constant 0 : i32
    %c0_i32_0 = arith.constant 0 : i32
    return %arg0, %arg1, %c0_i32 : i32, i32, i32
  }
}

</mosaic_0001>

<bundles_post_ra>
// kernel: tpu_custom_call.1
= control target key start
LH: loop header
LB: loop body
LE: loop exit
PB: predicated region body
PF: predicated region fallthrough
CT: control target
= control target key end

     0   :  { %s1540_s0 = inlined_call_operand.vmem [shape: f32[2,8,32], index: 0, kind: input, shape index: {}]   ;;  %s1541_s1 = inlined_call_operand.vmem [shape: f32[32,96], index: 1, kind: input, shape index: {}]   ;;  %s1542_s2 = inlined_call_operand.vmem [shape: f32[1,96], index: 2, kind: input, shape index: {}]   ;;  %s1543_s3 = inlined_call_operand.vmem [shape: f32[4,8,32], index: 3, kind: input, shape index: {}]   ;;  %s1544_s4 = inlined_call_operand.vmem [shape: f32[1,32], index: 4, kind: input, shape index: {}]   ;;  %s1545_s5 = inlined_call_operand.vmem [shape: f32[1,32], index: 5, kind: input, shape index: {}]   ;;  %s1546_s6 = inlined_call_operand.vmem [shape: f32[1,32], index: 6, kind: input, shape index: {}]   ;;  %s1547_s7 = inlined_call_operand.vmem [shape: f32[1,32], index: 7, kind: input, shape index: {}]   ;;  %s1548_s8 = inlined_call_operand.vmem [shape: f32[1,32], index: 8, kind: input, shape index: {}]   ;;  %s1549_s9 = inlined_call_operand.vmem [shape: f32[32,128], index: 9, kind: input, shape index: {}]   ;;  %s1550_s10 = inlined_call_operand.vmem [shape: f32[1,128], index: 10, kind: input, shape index: {}]   ;;  %s1551_s11 = inlined_call_operand.vmem [shape: f32[128,32], index: 11, kind: input, shape index: {}]   ;;  %s1552_s12 = inlined_call_operand.vmem [shape: f32[1,32], index: 12, kind: input, shape index: {}]   ;;  %s1553_s13 = inlined_call_operand.hbm [shape: f32[2,8,32], index: 13, kind: output, shape index: {}]  }
   0x1   :  { %1556 = sst [smem:[#allocation10_spill]] %s1540_s0 }
   0x2   :  { %1557 = sst [smem:[#allocation11_spill]] %s1541_s1 }
   0x3   :  { %1558 = sst [smem:[#allocation12_spill]] %s1542_s2 }
   0x4   :  { %1559 = sst [smem:[#allocation13_spill]] %s1543_s3 }
   0x5   :  { %18 = vsyncpa [#allocation7], 0 }
   0x6   :  { %20 = vsyncpa [#allocation7 + $0x1], 0  ;;  %s1267_s25 = smov 0   ;;  %s1269_s26 = smov 0  }
   0x7   :  { %s1271_s27 = smov 0   ;;  %s1273_s28 = smov 0  }
   0x8   :  { %s1275_s29 = smov 0   ;;  %s1277_s30 = smov 0  }
   0x9 LB: > { %s977_s14 = sadd.s32 4294967295, %s1182_s30   ;;  %s978_s15 = sadd.s32 4294967294, %s1182_s30   ;;  %s1182_s30 = sphi %s1277_s30, %s26_s30   ;;  %s1178_s29 = sphi %s1275_s29, %s1575_s29   ;;  %s1174_s28 = sphi %s1273_s28, %s1574_s28   ;;  %s1170_s27 = sphi %s1271_s27, %s1573_s27   ;;  %s1166_s26 = sphi %s1269_s26, %s1572_s26   ;;  %s1162_s25 = sphi %s1267_s25, %s1571_s25  }
   0xa   : > { %s38_s16 = sadd.s32 1, %s1178_s29  ;;  %s325_s17 = sadd.s32 1, %s1170_s27 }
   0xb   : > { %p40_p0 = scmp.ge.s32.totalorder %s38_s16, 2  ;;  %p335_p1 = scmp.ne.s32.totalorder %s1170_s27, %s1166_s26 }
   0xc   : > { %p336_p2 = scmp.eq.s32.totalorder %s977_s14, 1  ;;  %p341_p3 = scmp.ne.s32.totalorder %s1166_s26, %s1162_s25 }
   0xd   : > { %s1577_s16 = smov (%p40_p0, %s38_s16), 0  ;;  %p342_p5 = scmp.eq.s32.totalorder %s978_s15, 1 }
   0xe   : > { %1560 = sst [smem:[#allocation9_spill]] %s1577_s16  ;;  %p1307_p4 = por %p336_p2, %p335_p1 }
   0xf   : > { %s320_s19 = ssub.s32 %s1178_s29, %s1577_s16  ;;  %p981_p6 = scmp.ge.s32.totalorder %s1182_s30, 1 }
  0x10   : > { %p323_p7 = scmp.eq.s32.totalorder %s320_s19, 0  ;;  %p1314_p8 = por %p342_p5, %p341_p3 }
  0x11   : > { %p403_p9 = scmp.lt.s32.totalorder %s1182_s30, 3 }
  0x12   : > { %s1320_s21 = scalar_select %p323_p7, %s1170_s27, %s325_s17  }
  0x13   : > { %p404_p10 = pnand %p981_p6, %p403_p9 }
  0x14   : > { %p446_p11 = scmp.lt.s32.totalorder (!%p404_p10), %s1174_s28, 1  ;;  %s1563_s0 = sld [smem:[#allocation10_spill]] (!%p404_p10) }
  0x15   : > { %407 = sbr.rel (%p404_p10) target bundleno = 1776 (0x6f0), region = 72  ;;  %s1564_s1 = sld [smem:[#allocation11_spill]] (!%p404_p10) }
  0x16   : > { %s1565_s2 = sld [smem:[#allocation12_spill]] (!%p404_p10)  ;;  %s1191_s17 = smov (!%p404_p10), 112  }
  0x17   : > { %s1192_s19 = smov (!%p404_p10), 120   ;;  %s1194_s24 = smov (!%p404_p10), 88  }
  0x18   : > { %s1195_s14 = smov (!%p404_p10), 80  }
  0x1a   : > { %vm456_vm0 = vcmask 261120   ;;  %v1188_v0 = vmov 0.0   ;;  %s447_s22 = scalar_select %p446_p11, %s1174_s28, 1  ;;  %v1189_v3 = vmov 32.0   ;;  %v1078_v47 = vld [vmem:[%s1545_s5] ss:$0 sm:$0xff] }
  0x1b   : > { %653 = vst.msk [vmem:[#allocation5] sm:$0xff] %vm456_vm0, %v1188_v0  ;;  %1081 = vrcp.f32 %v1189_v3  ;;  %v520_v6 = vld [vmem:[%s1564_s1 + $0x10] sm:$0xff]  ;;  %v521_v7 = vld [vmem:[%s1564_s1 + $0x18] sm:$0xff]  ;;  %v518_v10 = vld [vmem:[%s1564_s1] sm:$0xff]  ;;  %vm592_vm8 = vcmask 64512  }
  0x1c   : > { %s983_s23 = sshll.u32 %s447_s22, 3  ;;  %v1068_v8 = vpack.i.bf16 %v520_v6, %v521_v7  ;;  %583 = vmatpush.msra.mxu1 %v521_v7  ;;  %v519_v11 = vld [vmem:[%s1564_s1 + $0x8] sm:$0xff]  ;;  %v1080_v35 = vld [vmem:[%s1565_s2] ss:$0 sm:$0xff]  ;;  %s1193_s22 = smov 104  }
  0x1d   : > { %s449_s15 = scalar_lea.vmem %s1563_s0, %s983_s23  ;;  %s1190_s23 = smov 96   ;;  %v1073_v13 = vpack.i.bf16 %v518_v10, %v519_v11  ;;  %v1079_v50 = vld [vmem:[%s1546_s6] ss:$0 sm:$0xff] }
  0x1e   : > { %v1328_v1 = vld [vmem:[%s449_s15] sm:$0xff]  ;;  %1069 = vrot.lane.b32.xlu2 %v1068_v8, %s1190_s23  ;;  %584 = vmatpush.msra.mxu1 %v520_v6  ;;  %s1555_s0 = sand.u32 1, %s1166_s26   ;;  %s1196_s15 = smov 72  }
  0x1f   : > { %v494_v2 = vsel %vm456_vm0, %v1328_v1, 0.0  ;;  %s1357_s16 = sshll.u32 %s1555_s0, 3 }
  0x20   : > { %495 = vadd.xlane.f32.xlu0 %v494_v2  ;;  %585 = vmatpush.msra.mxu1 %v519_v11 }
  0x21   : > { %v1082_v4 = vpop.eup %1081 }
  0x22   : > { %v461_v5 = vmul.f32 32.0, %v1082_v4  ;;  %586 = vmatpush.msra.mxu1 %v518_v10  ;;  %vm465_vm1 = vweird.f32 %v1082_v4 }
  0x24   : > { %v462_v9 = vsub.f32 1.0, %v461_v5  ;;  %v646_v5 = vlaneseq }
  0x26   : > { %v463_v12 = vmul.f32 %v1082_v4, %v462_v9  ;;  %1074 = vrot.lane.b32.xlu2 %v1073_v13, %s1190_s23  ;;  %v1377_v7 = vshrl.u32 %v646_v5, 7  ;;  %v651_v8 = vand.u32 127, %v646_v5 }
  0x28   : > { %458 = vadd.xlane.f32.xlu0 %v494_v2  ;;  %v464_v14 = vadd.f32 %v1082_v4, %v463_v12  ;;  %vm652_vm9 = vcmp.ge.s32.totalorder %v1377_v7, %v651_v8 }
  0x2a   : > { %v1346_v15 = vsel %vm465_vm1, %v1082_v4, %v464_v14 }
  0x3c   : > { %541 = vrot.lane.b32.xlu0 %v1080_v35, %s1190_s23 }
  0x78   : > { %v1070_v26 = vpop.permute.xlu2 %1069 }
  0x79   : > { %v1071_v27 = vunpack.i.l.bf16 %v1070_v26  ;;  %v1072_v28 = vunpack.i.h.bf16 %v1070_v26 }
  0x7b   : > { %559 = vmatpush.msra.mxu0 %v1071_v27 }
  0x7d   : > { %560 = vmatpush.msra.mxu0 %v1072_v28 }
  0x80   : > { %v1075_v29 = vpop.permute.xlu2 %1074 }
  0x81   : > { %v1076_v30 = vunpack.i.l.bf16 %v1075_v29  ;;  %v1077_v31 = vunpack.i.h.bf16 %v1075_v29 }
  0x83   : > { %561 = vmatpush.msra.mxu0 %v1076_v30 }
  0x85   : > { %562 = vmatpush.msra.mxu0 %v1077_v31 }
  0x93   : > { %v496_v16 = vpop.xlane.xlu0 %495 }
  0x94   : > { %v497_v17 = vmul.f32 %v496_v16, %v1346_v15 }
  0x96   : > { %v498_v18 = vsub.f32 %v1328_v1, %v497_v17 }
  0x98   : > { %v499_v19 = vmul.f32 %v498_v18, %v498_v18 }
  0x9a   : > { %v500_v20 = vsel %vm456_vm0, %v499_v19, 0.0 }
  0x9b   : > { %501 = vadd.xlane.f32.xlu1 %v500_v20  ;;  %v459_v21 = vpop.xlane.xlu0 %458 }
  0x9c   : > { %v467_v22 = vmul.f32 %v1346_v15, %v459_v21 }
  0x9e   : > { %v468_v23 = vsub.f32 %v1328_v1, %v467_v22 }
  0xa0   : > { %v469_v24 = vmul.f32 %v468_v23, %v468_v23 }
  0xa2   : > { %v470_v25 = vsel %vm456_vm0, %v469_v24, 0.0 }
  0xa3   : > { %471 = vadd.xlane.f32.xlu1 %v470_v25 }
  0xae   : > { %v542_v0 = vpop.permute.xlu0 %541 }
 0x10e   : > { %v502_v32 = vpop.xlane.xlu1 %501 }
 0x10f   : > { %v503_v33 = vmul.f32 %v502_v32, %v1346_v15 }
 0x111   : > { %v504_v34 = vadd.f32 1e-05, %v503_v33 }
 0x113   : > { %1083 = vrsqrt.f32 %v504_v34  ;;  %vm511_vm3 = vweird.f32 %v504_v34 }
 0x116   : > { %v472_v36 = vpop.xlane.xlu1 %471 }
 0x117   : > { %v473_v37 = vmul.f32 %v472_v36, %v1346_v15 }
 0x119   : > { %v1084_v38 = vpop.eup %1083  ;;  %v474_v39 = vadd.f32 1e-05, %v473_v37 }
 0x11a   : > { %v506_v40 = vmul.f32 %v1084_v38, %v504_v34  ;;  %vm512_vm2 = vweird.f32 %v1084_v38 }
 0x11b   : > { %1085 = vrsqrt.f32 %v474_v39  ;;  %vm513_vm4 = vmor %vm511_vm3, %vm512_vm2  ;;  %vm481_vm6 = vweird.f32 %v474_v39 }
 0x11c   : > { %v507_v41 = vmul.f32 %v1084_v38, %v506_v40 }
 0x11e   : > { %v508_v42 = vmul.f32 0.5, %v507_v41 }
 0x120   : > { %v509_v43 = vsub.f32 1.5, %v508_v42 }
 0x121   : > { %v1086_v44 = vpop.eup %1085 }
 0x122   : > { %v510_v45 = vmul.f32 %v1084_v38, %v509_v43  ;;  %v476_v46 = vmul.f32 %v1086_v44, %v474_v39  ;;  %vm482_vm5 = vweird.f32 %v1086_v44 }
 0x123   : > { %vm483_vm7 = vmor %vm481_vm6, %vm482_vm5 }
 0x124   : > { %v514_v48 = vsel %vm513_vm4, %v1084_v38, %v510_v45  ;;  %v477_v49 = vmul.f32 %v1086_v44, %v476_v46 }
 0x125   : > { %v515_v51 = vmul.f32 %v514_v48, %v498_v18 }
 0x126   : > { %v478_v52 = vmul.f32 0.5, %v477_v49 }
 0x127   : > { %v516_v53 = vmul.f32 %v1078_v47, %v515_v51 }
 0x128   : > { %v479_v54 = vsub.f32 1.5, %v478_v52 }
 0x129   : > { %v517_v55 = vadd.f32 %v1079_v50, %v516_v53 }
 0x12a   : > { %v480_v56 = vmul.f32 %v1086_v44, %v479_v54 }
 0x12b   : > { %985 = vmatmul.msk.f32.vlgmr.msra.gmra.mxu1 %vm456_vm0, %v517_v55 }
 0x12c   : > { %v484_v57 = vsel %vm483_vm7, %v1086_v44, %v480_v56 }
 0x12d   : > { %v485_v58 = vmul.f32 %v484_v57, %v468_v23 }
 0x12f   : > { %v489_v59 = vmul.f32 %v1078_v47, %v485_v58 }
 0x131   : > { %v493_v60 = vadd.f32 %v1079_v50, %v489_v59 }
 0x133   : > { %984 = vmatmul.msk.f32.vlgmr.msra.gmra.mxu0 %vm456_vm0, %v493_v60 }
 0x1a8   : > { %v588_v61 = vpop.f32.mrf.mxu1 }
 0x1a9   : > { %v589_v62 = vadd.f32 %v1080_v35, %v588_v61 }
 0x1ab   : > { %v591_v63 = vmul.f32 0.35355338, %v589_v62 }
 0x1ad   : > { %593 = vst.msk [vmem:[#allocation2] sm:$0xff] %vm592_vm8, %v591_v63  ;;  %616 = vrot.lane.b32.xlu0 %v591_v63, %s1191_s17 }
 0x1b0   : > { %v564_v2 = vpop.f32.mrf.mxu0 }
 0x1b1   : > { %v565_v3 = vadd.f32 %v564_v2, %v542_v0 }
 0x1b3   : > { %594 = vst.msk [vmem:[#allocation3] sm:$0xff] %vm592_vm8, %v565_v3  ;;  %606 = vrot.lane.b32.xlu2 %v565_v3, %s1192_s19  ;;  %596 = vrot.lane.b32.xlu1 %v565_v3, %s1190_s23 }
 0x1b5   : > { %631 = vrot.lane.b32.xlu0 %v591_v63, %s1193_s22 }
 0x1bb   : > { %611 = vrot.lane.b32.xlu2 %v565_v3, %s1194_s24  ;;  %626 = vrot.lane.b32.xlu1 %v565_v3, %s1195_s14 }
 0x1c3   : > { %621 = vrot.lane.b32.xlu2 %v565_v3, %s1191_s17  ;;  %641 = vrot.lane.b32.xlu1 %v565_v3, %s1196_s15  ;;  %s1390_s17 = smov 0  }
 0x1cb   : > { %601 = vrot.lane.b32.xlu2 %v591_v63, %s1192_s19 }
 0x1d3   : > { %636 = vrot.lane.b32.xlu2 %v565_v3, %s1193_s22 }
 0x20d   : > { %v607_v4 = vpop.permute.xlu2 %606 }
 0x20e   : > { %610 = vst.msk [vmem:[#allocation3 + $0x8] sm:$0xff] %vm592_vm8, %v607_v4 }
 0x215   : > { %v612_v6 = vpop.permute.xlu2 %611 }
 0x216   : > { %615 = vst.msk [vmem:[#allocation4 + $0x8] sm:$0xff] %vm592_vm8, %v612_v6 }
 0x21d   : > { %v622_v9 = vpop.permute.xlu2 %621 }
 0x21e   : > { %625 = vst.msk [vmem:[#allocation3 + $0x10] sm:$0xff] %vm592_vm8, %v622_v9 }
 0x21f   : > { %v617_v10 = vpop.permute.xlu0 %616 }
 0x220   : > { %620 = vst.msk [vmem:[#allocation2 + $0x10] sm:$0xff] %vm592_vm8, %v617_v10 }
 0x225   : > { %v602_v11 = vpop.permute.xlu2 %601  ;;  %v597_v12 = vpop.permute.xlu1 %596 }
 0x226   : > { %605 = vst.msk [vmem:[#allocation2 + $0x8] sm:$0xff] %vm592_vm8, %v602_v11 }
 0x227   : > { %599 = vst.msk [vmem:[#allocation4] sm:$0xff] %vm592_vm8, %v597_v12  ;;  %v632_v13 = vpop.permute.xlu0 %631 }
 0x228   : > { %635 = vst.msk [vmem:[#allocation2 + $0x18] sm:$0xff] %vm592_vm8, %v632_v13 }
 0x22d   : > { %v637_v14 = vpop.permute.xlu2 %636  ;;  %v627_v16 = vpop.permute.xlu1 %626 }
 0x22e   : > { %640 = vst.msk [vmem:[#allocation3 + $0x18] sm:$0xff] %vm592_vm8, %v637_v14 }
 0x22f   : > { %630 = vst.msk [vmem:[#allocation4 + $0x10] sm:$0xff] %vm592_vm8, %v627_v16 }
 0x235   : > { %v642_v17 = vpop.permute.xlu1 %641 }
 0x236   : > { %645 = vst.msk [vmem:[#allocation4 + $0x18] sm:$0xff] %vm592_vm8, %v642_v17 }
 0x237 LB: >> { %s986_s19 = sshll.u32 %s1186_s17, 3  ;;  %s1566_s3 = sld [smem:[#allocation13_spill]]  ;;  %v728_v34 = vld [vmem:[#allocation5] sm:$0xff]  ;;  %s1186_s17 = sphi %s1390_s17, %s659_s17  }
 0x238   : >> { %s663_s22 = scalar_lea.vmem [#allocation3], %s986_s19  ;;  %s661_s24 = scalar_lea.vmem [#allocation2], %s986_s19 }
 0x239   : >> { %v664_v18 = vld [vmem:[%s663_s22] sm:$0xff]  ;;  %s665_s14 = scalar_lea.vmem [#allocation4], %s986_s19  ;;  %s659_s17 = sadd.s32 1, %s1186_s17  }
 0x23a   : >> { %987 = vmatpush.xpose.msk.msra.mxu0 %vm592_vm8, %v664_v18  ;;  %v662_v19 = vld [vmem:[%s661_s24] sm:$0xff]  ;;  %p656_p12 = scmp.ge.s32.totalorder %s659_s17, 4  }
 0x23b   : > { %v1091_v38 = vld [vmem:[%s1544_s4] ss:$0 sm:$0xff] (%p656_p12)  ;;  %v798_v47 = vld [vmem:[%s1549_s9 + $0x18] sm:$0xff] (%p656_p12)  ;;  %v796_v48 = vld [vmem:[%s1549_s9 + $0x8] sm:$0xff] (%p656_p12)  ;;  %s993_s1 = sshll.u32 (%p656_p12), %s1174_s28, 3  ;;  %s1567_s22 = scalar_lea.vmem (%p656_p12), [#allocation6], %s1357_s16 }
 0x23c   : > { %v795_v49 = vld [vmem:[%s1549_s9] sm:$0xff] (%p656_p12)  ;;  %v850_v50 = vld [vmem:[%s1551_s11 + $0x78] sm:$0xff] (%p656_p12)  ;;  %v849_v51 = vld [vmem:[%s1551_s11 + $0x70] sm:$0xff] (%p656_p12)  ;;  %s1568_s28 = smov (%p656_p12), %s1567_s22  ;;  %s1569_s23 = sand.u32 (%p656_p12), 1, %s1166_s26  }
 0x23d   : >> { %988 = vmatmul.msk.f32.vlgmr.msra.gmra.mxu0 %vm592_vm8, %v662_v19  ;;  %v666_v28 = vld [vmem:[%s665_s14] sm:$0xff]  ;;  %s729_s24 = scalar_lea.vmem %s1566_s3, %s986_s19  ;;  %v848_v52 = vld [vmem:[%s1551_s11 + $0x68] sm:$0xff] (%p656_p12)  ;;  %v846_v5 = vld [vmem:[%s1551_s11 + $0x58] sm:$0xff] (%p656_p12)  ;;  %s889_s19 = scalar_lea.hbm (%p656_p12), %s1553_s13, %s993_s1 }
 0x23e   : >> { %723 = vmatpush.msra.mxu1 %v666_v28  ;;  %v730_v32 = vld [vmem:[%s729_s24] sm:$0xff]  ;;  %818 = vmatpush.msra.mxu0 (%p656_p12), %v798_v47  ;;  %v845_v6 = vld [vmem:[%s1551_s11 + $0x50] sm:$0xff] (%p656_p12)  ;;  %v844_v7 = vld [vmem:[%s1551_s11 + $0x48] sm:$0xff] (%p656_p12)  ;;  %s891_s24 = sshll.u32 (%p656_p12), %s1567_s22, 4  ;;  %s893_s0 = sshll.u32 (%p656_p12), %s889_s19, 4  ;;  %s892_s24 = int_to_ptr.vmem [resolvable:$true] %s891_s24  ;;  %s894_s0 = int_to_ptr.hbm [resolvable:$true] %s893_s0 }
 0x23f   : >> { %749 = vmatpush.msra.mxu2 %v730_v32  ;;  %v847_v55 = vld [vmem:[%s1551_s11 + $0x60] sm:$0xff] (%p656_p12)  ;;  %v842_v9 = vld [vmem:[%s1551_s11 + $0x38] sm:$0xff] (%p656_p12)  ;;  %v841_v10 = vld [vmem:[%s1551_s11 + $0x30] sm:$0xff] (%p656_p12)  ;;  %s878_s2 = scalar_lea.sflag (%p656_p12), [#allocation7], %s1569_s23  ;;  %s1114_s14 = sshra.s32 (%p656_p12), %s894_s0, 4  ;;  %s1115_s14 = int_to_ptr.hbm [resolvable:$true] %s1114_s14 }
 0x240   : > { %v1093_v2 = vld [vmem:[%s1548_s8] ss:$0 sm:$0xff] (%p656_p12)  ;;  %v840_v11 = vld [vmem:[%s1551_s11 + $0x28] sm:$0xff] (%p656_p12)  ;;  %v838_v13 = vld [vmem:[%s1551_s11 + $0x18] sm:$0xff] (%p656_p12)  ;;  %s1116_s3 = scalar_lea.hbm (%p656_p12), %s1115_s14, 8  ;;  %s1120_s17 = scalar_lea.hbm (%p656_p12), %s1553_s13, 16 }
 0x241   : > { %v843_v8 = vld [vmem:[%s1551_s11 + $0x40] sm:$0xff] (%p656_p12)  ;;  %v837_v14 = vld [vmem:[%s1551_s11 + $0x10] sm:$0xff] (%p656_p12)  ;;  %v836_v16 = vld [vmem:[%s1551_s11 + $0x8] sm:$0xff] (%p656_p12)  ;;  %p1117_p13 = scmp.ne.s32.totalorder (%p656_p12), %s1115_s14, %s1116_s3  ;;  %p1121_p2 = scmp.lt.s32.totalorder (%p656_p12), %s1115_s14, %s1553_s13 }
 0x242   : > { %v839_v12 = vld [vmem:[%s1551_s11 + $0x20] sm:$0xff] (%p656_p12)  ;;  %p1122_p3 = scmp.lt.s32.totalorder (%p656_p12), %s1120_s17, %s1116_s3 }
 0x243   : > { %v835_v17 = vld [vmem:[%s1551_s11] sm:$0xff] (%p656_p12)  ;;  %p1118_p0 = pnand (%p656_p12), %p1117_p13, %p1307_p4 }
 0x244   : > { %v1094_v18 = vld [vmem:[%s1550_s10] ss:$0 sm:$0xff] (%p656_p12)  ;;  %p1123_p5 = por (%p656_p12), %p1122_p3, %p1121_p2 }
 0x245   : > { %p1119_p1 = pneg (%p656_p12), %p1118_p0 }
 0x247   : > { %p1124_p6 = pnand (%p656_p12), %p1123_p5, %p1119_p1 }
 0x2ba   : >> { %v690_v20 = vpop.f32.mrf.mxu0 }
 0x2bb   : >> { %v693_v21 = vsel %vm652_vm9, %v690_v20, -1e+30 }
 0x2bc   : >> { %v694_v22 = vsel %vm592_vm8, %v693_v21, -inf }
 0x2bd   : >> { %695 = vmax.xlane.f32.xlu0 %v694_v22 }
 0x330   : >> { %v696_v23 = vpop.xlane.xlu0 %695 }
 0x331   : >> { %v697_v24 = vsub.f32 %v693_v21, %v696_v23 }
 0x333   : >> { %v698_v25 = vmul.f32 1.442695, %v697_v24 }
 0x335   : >> { %1087 = vpow2.f32 %v698_v25 }
 0x33b   : >> { %v1088_v26 = vpop.eup %1087 }
 0x33c   : >> { %v700_v27 = vsel %vm592_vm8, %v1088_v26, 0.0 }
 0x33d   : >> { %701 = vadd.xlane.f32.xlu0 %v700_v27 }
 0x3b0   : >> { %v702_v29 = vpop.xlane.xlu0 %701 }
 0x3b1   : >> { %1089 = vrcp.f32 %v702_v29 }
 0x3b7   : >> { %v1090_v30 = vpop.eup %1089 }
 0x3b8   : >> { %v704_v31 = vmul.f32 %v1090_v30, %v1088_v26  ;;  %v1095_v30 = vld [vmem:[%s1552_s12] ss:$0 sm:$0xff] (%p656_p12) }
 0x3ba   : >> { %989 = vmatmul.msk.f32.vlgmr.msra.gmra.mxu1 %vm592_vm8, %v704_v31 }
 0x3bb   : > { %855 = vmatpush.msra.mxu1 (%p656_p12), %v850_v50 }
 0x3bd   : > { %856 = vmatpush.msra.mxu1 (%p656_p12), %v849_v51 }
 0x3bf   : > { %857 = vmatpush.msra.mxu1 (%p656_p12), %v848_v52 }
 0x3c1   : > { %858 = vmatpush.msra.mxu1 (%p656_p12), %v847_v55 }
 0x3c3   : > { %859 = vmatpush.msra.mxu1 (%p656_p12), %v846_v5 }
 0x3c5   : > { %860 = vmatpush.msra.mxu1 (%p656_p12), %v845_v6 }
 0x3c7   : > { %861 = vmatpush.msra.mxu1 (%p656_p12), %v844_v7 }
 0x3c9   : > { %862 = vmatpush.msra.mxu1 (%p656_p12), %v843_v8 }
 0x3cb   : > { %863 = vmatpush.msra.mxu1 (%p656_p12), %v842_v9 }
 0x3cd   : > { %864 = vmatpush.msra.mxu1 (%p656_p12), %v841_v10 }
 0x3cf   : > { %865 = vmatpush.msra.mxu1 (%p656_p12), %v840_v11 }
 0x3d1   : > { %866 = vmatpush.msra.mxu1 (%p656_p12), %v839_v12 }
 0x3d3   : > { %867 = vmatpush.msra.mxu1 (%p656_p12), %v838_v13 }
 0x3d5   : > { %868 = vmatpush.msra.mxu1 (%p656_p12), %v837_v14 }
 0x3d7   : > { %869 = vmatpush.msra.mxu1 (%p656_p12), %v836_v16 }
 0x3d9   : > { %870 = vmatpush.msra.mxu1 (%p656_p12), %v835_v17 }
 0x437   : >> { %v725_v33 = vpop.f32.mrf.mxu1 }
 0x438   : >> { %990 = vmatmul.msk.f32.vlgmr.msra.gmra.mxu2 %vm592_vm8, %v725_v33 }
 0x4ba   : > { %658 = sbr.rel (!%p656_p12) target bundleno = 567 (0x237), region = 128 }
 0x4bb   : >> { %v751_v35 = vpop.f32.mrf.mxu2 }
 0x4bc   : >> { %v754_v36 = vadd.f32 %v751_v35, %v728_v34 }
 0x4be   : >> { %755 = vst.msk [vmem:[#allocation5] sm:$0xff] %vm456_vm0, %v754_v36 }
 0x4c5   : > { %v756_v37 = vld [vmem:[#allocation5] sm:$0xff] }
 0x4c6   : > { %v757_v39 = vadd.f32 %v756_v37, %v1328_v1  ;;  %v797_v1 = vld [vmem:[%s1549_s9 + $0x10] sm:$0xff] }
 0x4c7   : > { %819 = vmatpush.msra.mxu0 %v797_v1 }
 0x4c8   : > { %v1415_v40 = vadd.f32 %v1091_v38, %v757_v39 }
 0x4c9   : > { %820 = vmatpush.msra.mxu0 %v796_v48 }
 0x4ca   : > { %v765_v41 = vsel %vm456_vm0, %v1415_v40, 0.0 }
 0x4cb   : > { %766 = vadd.xlane.f32.xlu0 %v765_v41  ;;  %821 = vmatpush.msra.mxu0 %v795_v49 }
 0x53e   : > { %v767_v42 = vpop.xlane.xlu0 %766 }
 0x53f   : > { %v768_v43 = vmul.f32 %v767_v42, %v1346_v15 }
 0x541   : > { %v769_v44 = vsub.f32 %v1415_v40, %v768_v43 }
 0x543   : > { %v770_v45 = vmul.f32 %v769_v44, %v769_v44 }
 0x545   : > { %v771_v46 = vsel %vm456_vm0, %v770_v45, 0.0 }
 0x546   : > { %772 = vadd.xlane.f32.xlu0 %v771_v46 }
 0x5b9   : > { %v773_v53 = vpop.xlane.xlu0 %772 }
 0x5ba   : > { %v774_v54 = vmul.f32 %v773_v53, %v1346_v15  ;;  %v1092_v15 = vld [vmem:[%s1547_s7] ss:$0 sm:$0xff] }
 0x5bc   : > { %v775_v56 = vadd.f32 1e-05, %v774_v54 }
 0x5be   : > { %1096 = vrsqrt.f32 %v775_v56  ;;  %vm782_vm11 = vweird.f32 %v775_v56 }
 0x5c4   : > { %v1097_v57 = vpop.eup %1096 }
 0x5c5   : > { %v777_v58 = vmul.f32 %v1097_v57, %v775_v56  ;;  %vm783_vm10 = vweird.f32 %v1097_v57 }
 0x5c6   : > { %vm784_vm12 = vmor %vm782_vm11, %vm783_vm10 }
 0x5c7   : > { %v778_v59 = vmul.f32 %v1097_v57, %v777_v58 }
 0x5c9   : > { %v779_v60 = vmul.f32 0.5, %v778_v59 }
 0x5cb   : > { %v780_v61 = vsub.f32 1.5, %v779_v60 }
 0x5cd   : > { %v781_v62 = vmul.f32 %v1097_v57, %v780_v61 }
 0x5cf   : > { %v785_v63 = vsel %vm784_vm12, %v1097_v57, %v781_v62 }
 0x5d0   : > { %v786_v0 = vmul.f32 %v785_v63, %v769_v44 }
 0x5d2   : > { %v790_v3 = vmul.f32 %v1092_v15, %v786_v0 }
 0x5d4   : > { %v794_v4 = vadd.f32 %v1093_v2, %v790_v3 }
 0x5d6   : > { %991 = vmatmul.msk.f32.vlgmr.msra.gmra.mxu0 %vm456_vm0, %v794_v4 }
 0x653   : > { %v823_v19 = vpop.f32.mrf.mxu0 }
 0x654   : > { %v824_v20 = vadd.f32 %v1094_v18, %v823_v19 }
 0x656   : > { %v827_v21 = vmul.f32 0.044715, %v824_v20  ;;  %v826_v27 = vmul.f32 0.5, %v824_v20 }
 0x658   : > { %v828_v22 = vmul.f32 %v827_v21, %v824_v20 }
 0x65a   : > { %v829_v23 = vmul.f32 %v828_v22, %v824_v20 }
 0x65c   : > { %v830_v24 = vadd.f32 %v829_v23, %v824_v20 }
 0x65e   : > { %v831_v25 = vmul.f32 0.7978846, %v830_v24 }
 0x660   : > { %1098 = vtanh.f32 %v831_v25 }
 0x666   : > { %v1099_v26 = vpop.eup %1098 }
 0x667   : > { %v833_v28 = vadd.f32 1.0, %v1099_v26 }
 0x669   : > { %v834_v29 = vmul.f32 %v833_v28, %v826_v27 }
 0x66b   : > { %871 = vmatmul.f32.vlgmr.msra.gmra.mxu1 %v834_v29 }
 0x6e8   : > { %v872_v31 = vpop.f32.mrf.mxu1 }
 0x6e9   : > { %v873_v32 = vadd.f32 %v1095_v30, %v872_v31 }
 0x6eb   : > { %v875_v33 = vadd.f32 %v873_v32, %v1415_v40 }
 0x6ed   : > { %876 = vst.msk [vmem:[%s1568_s28] sm:$0xff] %vm456_vm0, %v875_v33 }
 0x6ee   : > { %1127 = shalt.err (!%p1124_p6)
}
 0x6ef   : > { %996 = dma.vmem_to_hbm [thread:$0]  (%p1307_p4), %s892_s24, 128, %s894_s0, %s878_s2  }
 0x6f0 PF: > { %p1002_p7 = scmp.ge.s32.totalorder %s1182_s30, 2  ;;  %s905_s16 = sand.u32 1, %s1162_s25  }
 0x6f1   : > { %s906_s28 = scalar_lea.sflag [#allocation7], %s905_s16 }
 0x6f2   : > { %p999_p9 = pnand %p1002_p7, %p1314_p8 }
 0x6f4   : > { %p1000_p10 = pneg %p999_p9 }
 0x6f6   : > { %1157 = dma.done.wait (%p1000_p10), %s906_s28, 128  }
 0x6f7   : > { %1159 = vsyncadd (%p1000_p10), %s906_s28, 4294967168  ;;  %s26_s30 = sadd.s32 1, %s1182_s30   ;;  %s1570_s3 = sld [smem:[#allocation9_spill]] }
 0x6f8   : > { %p23_p11 = scmp.ge.s32.totalorder %s26_s30, 4   ;;  %s1571_s25 = smov %s1166_s26 }
 0x6f9   : > { %s1572_s26 = smov %s1170_s27  ;;  %s1573_s27 = smov %s1320_s21 }
 0x6fa   : > { %s1574_s28 = smov %s1178_s29  ;;  %25 = sbr.rel (!%p23_p11) target bundleno = 9 (0x9), region = 139 }
 0x6fd   : > { %s1575_s29 = smov %s1570_s3 }
 0x6ff   :  { %912 = vsyncpa [#allocation7], 1 }
 0x700   :  { %914 = vsyncpa [#allocation7 + $0x1], 1 }

// kernel: tpu_custom_call.1
= control target key start
LH: loop header
LB: loop body
LE: loop exit
PB: predicated region body
PF: predicated region fallthrough
CT: control target
= control target key end

     0   :  { %s1540_s0 = inlined_call_operand.vmem [shape: f32[2,8,32], index: 0, kind: input, shape index: {}]   ;;  %s1541_s1 = inlined_call_operand.vmem [shape: f32[32,96], index: 1, kind: input, shape index: {}]   ;;  %s1542_s2 = inlined_call_operand.vmem [shape: f32[1,96], index: 2, kind: input, shape index: {}]   ;;  %s1543_s3 = inlined_call_operand.vmem [shape: f32[4,8,32], index: 3, kind: input, shape index: {}]   ;;  %s1544_s4 = inlined_call_operand.vmem [shape: f32[1,32], index: 4, kind: input, shape index: {}]   ;;  %s1545_s5 = inlined_call_operand.vmem [shape: f32[1,32], index: 5, kind: input, shape index: {}]   ;;  %s1546_s6 = inlined_call_operand.vmem [shape: f32[1,32], index: 6, kind: input, shape index: {}]   ;;  %s1547_s7 = inlined_call_operand.vmem [shape: f32[1,32], index: 7, kind: input, shape index: {}]   ;;  %s1548_s8 = inlined_call_operand.vmem [shape: f32[1,32], index: 8, kind: input, shape index: {}]   ;;  %s1549_s9 = inlined_call_operand.vmem [shape: f32[32,128], index: 9, kind: input, shape index: {}]   ;;  %s1550_s10 = inlined_call_operand.vmem [shape: f32[1,128], index: 10, kind: input, shape index: {}]   ;;  %s1551_s11 = inlined_call_operand.vmem [shape: f32[128,32], index: 11, kind: input, shape index: {}]   ;;  %s1552_s12 = inlined_call_operand.vmem [shape: f32[1,32], index: 12, kind: input, shape index: {}]   ;;  %s1553_s13 = inlined_call_operand.hbm [shape: f32[2,8,32], index: 13, kind: output, shape index: {}]  }
   0x1   :  { %1556 = sst [smem:[#allocation10_spill]] %s1540_s0 }
   0x2   :  { %1557 = sst [smem:[#allocation11_spill]] %s1541_s1 }
   0x3   :  { %1558 = sst [smem:[#allocation12_spill]] %s1542_s2 }
   0x4   :  { %1559 = sst [smem:[#allocation13_spill]] %s1543_s3 }
   0x5   :  { %18 = vsyncpa [#allocation7], 0 }
   0x6   :  { %20 = vsyncpa [#allocation7 + $0x1], 0  ;;  %s1267_s25 = smov 0   ;;  %s1269_s26 = smov 0  }
   0x7   :  { %s1271_s27 = smov 0   ;;  %s1273_s28 = smov 0  }
   0x8   :  { %s1275_s29 = smov 0   ;;  %s1277_s30 = smov 0  }
   0x9 LB: > { %s977_s14 = sadd.s32 4294967295, %s1182_s30   ;;  %s978_s15 = sadd.s32 4294967294, %s1182_s30   ;;  %s1182_s30 = sphi %s1277_s30, %s26_s30   ;;  %s1178_s29 = sphi %s1275_s29, %s1575_s29   ;;  %s1174_s28 = sphi %s1273_s28, %s1574_s28   ;;  %s1170_s27 = sphi %s1271_s27, %s1573_s27   ;;  %s1166_s26 = sphi %s1269_s26, %s1572_s26   ;;  %s1162_s25 = sphi %s1267_s25, %s1571_s25  }
   0xa   : > { %s38_s16 = sadd.s32 1, %s1178_s29  ;;  %s325_s17 = sadd.s32 1, %s1170_s27 }
   0xb   : > { %p40_p0 = scmp.ge.s32.totalorder %s38_s16, 2  ;;  %p335_p1 = scmp.ne.s32.totalorder %s1170_s27, %s1166_s26 }
   0xc   : > { %p336_p2 = scmp.eq.s32.totalorder %s977_s14, 1  ;;  %p341_p3 = scmp.ne.s32.totalorder %s1166_s26, %s1162_s25 }
   0xd   : > { %s1577_s16 = smov (%p40_p0, %s38_s16), 0  ;;  %p342_p5 = scmp.eq.s32.totalorder %s978_s15, 1 }
   0xe   : > { %1560 = sst [smem:[#allocation9_spill]] %s1577_s16  ;;  %p1307_p4 = por %p336_p2, %p335_p1 }
   0xf   : > { %s320_s19 = ssub.s32 %s1178_s29, %s1577_s16  ;;  %p981_p6 = scmp.ge.s32.totalorder %s1182_s30, 1 }
  0x10   : > { %p323_p7 = scmp.eq.s32.totalorder %s320_s19, 0  ;;  %p1314_p8 = por %p342_p5, %p341_p3 }
  0x11   : > { %p403_p9 = scmp.lt.s32.totalorder %s1182_s30, 3 }
  0x12   : > { %s1320_s21 = scalar_select %p323_p7, %s1170_s27, %s325_s17  }
  0x13   : > { %p404_p10 = pnand %p981_p6, %p403_p9 }
  0x14   : > { %p446_p11 = scmp.lt.s32.totalorder (!%p404_p10), %s1174_s28, 1  ;;  %s1563_s0 = sld [smem:[#allocation10_spill]] (!%p404_p10) }
  0x15   : > { %407 = sbr.rel (%p404_p10) target bundleno = 1776 (0x6f0), region = 72  ;;  %s1564_s1 = sld [smem:[#allocation11_spill]] (!%p404_p10) }
  0x16   : > { %s1565_s2 = sld [smem:[#allocation12_spill]] (!%p404_p10)  ;;  %s1191_s17 = smov (!%p404_p10), 112  }
  0x17   : > { %s1192_s19 = smov (!%p404_p10), 120   ;;  %s1194_s24 = smov (!%p404_p10), 88  }
  0x18   : > { %s1195_s14 = smov (!%p404_p10), 80  }
  0x1a   : > { %vm456_vm0 = vcmask 261120   ;;  %v1188_v0 = vmov 0.0   ;;  %s447_s22 = scalar_select %p446_p11, %s1174_s28, 1  ;;  %v1189_v3 = vmov 32.0   ;;  %v1078_v47 = vld [vmem:[%s1545_s5] ss:$0 sm:$0xff] }
  0x1b   : > { %653 = vst.msk [vmem:[#allocation5] sm:$0xff] %vm456_vm0, %v1188_v0  ;;  %1081 = vrcp.f32 %v1189_v3  ;;  %v520_v6 = vld [vmem:[%s1564_s1 + $0x10] sm:$0xff]  ;;  %v521_v7 = vld [vmem:[%s1564_s1 + $0x18] sm:$0xff]  ;;  %v518_v10 = vld [vmem:[%s1564_s1] sm:$0xff]  ;;  %vm592_vm8 = vcmask 64512  }
  0x1c   : > { %s983_s23 = sshll.u32 %s447_s22, 3  ;;  %v1068_v8 = vpack.i.bf16 %v520_v6, %v521_v7  ;;  %583 = vmatpush.msra.mxu1 %v521_v7  ;;  %v519_v11 = vld [vmem:[%s1564_s1 + $0x8] sm:$0xff]  ;;  %v1080_v35 = vld [vmem:[%s1565_s2] ss:$0 sm:$0xff]  ;;  %s1193_s22 = smov 104  }
  0x1d   : > { %s449_s15 = scalar_lea.vmem %s1563_s0, %s983_s23  ;;  %s1190_s23 = smov 96   ;;  %v1073_v13 = vpack.i.bf16 %v518_v10, %v519_v11  ;;  %v1079_v50 = vld [vmem:[%s1546_s6] ss:$0 sm:$0xff] }
  0x1e   : > { %v1328_v1 = vld [vmem:[%s449_s15] sm:$0xff]  ;;  %1069 = vrot.lane.b32.xlu2 %v1068_v8, %s1190_s23  ;;  %584 = vmatpush.msra.mxu1 %v520_v6  ;;  %s1555_s0 = sand.u32 1, %s1166_s26   ;;  %s1196_s15 = smov 72  }
  0x1f   : > { %v494_v2 = vsel %vm456_vm0, %v1328_v1, 0.0  ;;  %s1357_s16 = sshll.u32 %s1555_s0, 3 }
  0x20   : > { %495 = vadd.xlane.f32.xlu0 %v494_v2  ;;  %585 = vmatpush.msra.mxu1 %v519_v11 }
  0x21   : > { %v1082_v4 = vpop.eup %1081 }
  0x22   : > { %v461_v5 = vmul.f32 32.0, %v1082_v4  ;;  %586 = vmatpush.msra.mxu1 %v518_v10  ;;  %vm465_vm1 = vweird.f32 %v1082_v4 }
  0x24   : > { %v462_v9 = vsub.f32 1.0, %v461_v5  ;;  %v646_v5 = vlaneseq }
  0x26   : > { %v463_v12 = vmul.f32 %v1082_v4, %v462_v9  ;;  %1074 = vrot.lane.b32.xlu2 %v1073_v13, %s1190_s23  ;;  %v1377_v7 = vshrl.u32 %v646_v5, 7  ;;  %v651_v8 = vand.u32 127, %v646_v5 }
  0x28   : > { %458 = vadd.xlane.f32.xlu0 %v494_v2  ;;  %v464_v14 = vadd.f32 %v1082_v4, %v463_v12  ;;  %vm652_vm9 = vcmp.ge.s32.totalorder %v1377_v7, %v651_v8 }
  0x2a   : > { %v1346_v15 = vsel %vm465_vm1, %v1082_v4, %v464_v14 }
  0x3c   : > { %541 = vrot.lane.b32.xlu0 %v1080_v35, %s1190_s23 }
  0x78   : > { %v1070_v26 = vpop.permute.xlu2 %1069 }
  0x79   : > { %v1071_v27 = vunpack.i.l.bf16 %v1070_v26  ;;  %v1072_v28 = vunpack.i.h.bf16 %v1070_v26 }
  0x7b   : > { %559 = vmatpush.msra.mxu0 %v1071_v27 }
  0x7d   : > { %560 = vmatpush.msra.mxu0 %v1072_v28 }
  0x80   : > { %v1075_v29 = vpop.permute.xlu2 %1074 }
  0x81   : > { %v1076_v30 = vunpack.i.l.bf16 %v1075_v29  ;;  %v1077_v31 = vunpack.i.h.bf16 %v1075_v29 }
  0x83   : > { %561 = vmatpush.msra.mxu0 %v1076_v30 }
  0x85   : > { %562 = vmatpush.msra.mxu0 %v1077_v31 }
  0x93   : > { %v496_v16 = vpop.xlane.xlu0 %495 }
  0x94   : > { %v497_v17 = vmul.f32 %v496_v16, %v1346_v15 }
  0x96   : > { %v498_v18 = vsub.f32 %v1328_v1, %v497_v17 }
  0x98   : > { %v499_v19 = vmul.f32 %v498_v18, %v498_v18 }
  0x9a   : > { %v500_v20 = vsel %vm456_vm0, %v499_v19, 0.0 }
  0x9b   : > { %501 = vadd.xlane.f32.xlu1 %v500_v20  ;;  %v459_v21 = vpop.xlane.xlu0 %458 }
  0x9c   : > { %v467_v22 = vmul.f32 %v1346_v15, %v459_v21 }
  0x9e   : > { %v468_v23 = vsub.f32 %v1328_v1, %v467_v22 }
  0xa0   : > { %v469_v24 = vmul.f32 %v468_v23, %v468_v23 }
  0xa2   : > { %v470_v25 = vsel %vm456_vm0, %v469_v24, 0.0 }
  0xa3   : > { %471 = vadd.xlane.f32.xlu1 %v470_v25 }
  0xae   : > { %v542_v0 = vpop.permute.xlu0 %541 }
 0x10e   : > { %v502_v32 = vpop.xlane.xlu1 %501 }
 0x10f   : > { %v503_v33 = vmul.f32 %v502_v32, %v1346_v15 }
 0x111   : > { %v504_v34 = vadd.f32 1e-05, %v503_v33 }
 0x113   : > { %1083 = vrsqrt.f32 %v504_v34  ;;  %vm511_vm3 = vweird.f32 %v504_v34 }
 0x116   : > { %v472_v36 = vpop.xlane.xlu1 %471 }
 0x117   : > { %v473_v37 = vmul.f32 %v472_v36, %v1346_v15 }
 0x119   : > { %v1084_v38 = vpop.eup %1083  ;;  %v474_v39 = vadd.f32 1e-05, %v473_v37 }
 0x11a   : > { %v506_v40 = vmul.f32 %v1084_v38, %v504_v34  ;;  %vm512_vm2 = vweird.f32 %v1084_v38 }
 0x11b   : > { %1085 = vrsqrt.f32 %v474_v39  ;;  %vm513_vm4 = vmor %vm511_vm3, %vm512_vm2  ;;  %vm481_vm6 = vweird.f32 %v474_v39 }
 0x11c   : > { %v507_v41 = vmul.f32 %v1084_v38, %v506_v40 }
 0x11e   : > { %v508_v42 = vmul.f32 0.5, %v507_v41 }
 0x120   : > { %v509_v43 = vsub.f32 1.5, %v508_v42 }
 0x121   : > { %v1086_v44 = vpop.eup %1085 }
 0x122   : > { %v510_v45 = vmul.f32 %v1084_v38, %v509_v43  ;;  %v476_v46 = vmul.f32 %v1086_v44, %v474_v39  ;;  %vm482_vm5 = vweird.f32 %v1086_v44 }
 0x123   : > { %vm483_vm7 = vmor %vm481_vm6, %vm482_vm5 }
 0x124   : > { %v514_v48 = vsel %vm513_vm4, %v1084_v38, %v510_v45  ;;  %v477_v49 = vmul.f32 %v1086_v44, %v476_v46 }
 0x125   : > { %v515_v51 = vmul.f32 %v514_v48, %v498_v18 }
 0x126   : > { %v478_v52 = vmul.f32 0.5, %v477_v49 }
 0x127   : > { %v516_v53 = vmul.f32 %v1078_v47, %v515_v51 }
 0x128   : > { %v479_v54 = vsub.f32 1.5, %v478_v52 }
 0x129   : > { %v517_v55 = vadd.f32 %v1079_v50, %v516_v53 }
 0x12a   : > { %v480_v56 = vmul.f32 %v1086_v44, %v479_v54 }
 0x12b   : > { %985 = vmatmul.msk.f32.vlgmr.msra.gmra.mxu1 %vm456_vm0, %v517_v55 }
 0x12c   : > { %v484_v57 = vsel %vm483_vm7, %v1086_v44, %v480_v56 }
 0x12d   : > { %v485_v58 = vmul.f32 %v484_v57, %v468_v23 }
 0x12f   : > { %v489_v59 = vmul.f32 %v1078_v47, %v485_v58 }
 0x131   : > { %v493_v60 = vadd.f32 %v1079_v50, %v489_v59 }
 0x133   : > { %984 = vmatmul.msk.f32.vlgmr.msra.gmra.mxu0 %vm456_vm0, %v493_v60 }
 0x1a8   : > { %v588_v61 = vpop.f32.mrf.mxu1 }
 0x1a9   : > { %v589_v62 = vadd.f32 %v1080_v35, %v588_v61 }
 0x1ab   : > { %v591_v63 = vmul.f32 0.35355338, %v589_v62 }
 0x1ad   : > { %593 = vst.msk [vmem:[#allocation2] sm:$0xff] %vm592_vm8, %v591_v63  ;;  %616 = vrot.lane.b32.xlu0 %v591_v63, %s1191_s17 }
 0x1b0   : > { %v564_v2 = vpop.f32.mrf.mxu0 }
 0x1b1   : > { %v565_v3 = vadd.f32 %v564_v2, %v542_v0 }
 0x1b3   : > { %594 = vst.msk [vmem:[#allocation3] sm:$0xff] %vm592_vm8, %v565_v3  ;;  %606 = vrot.lane.b32.xlu2 %v565_v3, %s1192_s19  ;;  %596 = vrot.lane.b32.xlu1 %v565_v3, %s1190_s23 }
 0x1b5   : > { %631 = vrot.lane.b32.xlu0 %v591_v63, %s1193_s22 }
 0x1bb   : > { %611 = vrot.lane.b32.xlu2 %v565_v3, %s1194_s24  ;;  %626 = vrot.lane.b32.xlu1 %v565_v3, %s1195_s14 }
 0x1c3   : > { %621 = vrot.lane.b32.xlu2 %v565_v3, %s1191_s17  ;;  %641 = vrot.lane.b32.xlu1 %v565_v3, %s1196_s15  ;;  %s1390_s17 = smov 0  }
 0x1cb   : > { %601 = vrot.lane.b32.xlu2 %v591_v63, %s1192_s19 }
 0x1d3   : > { %636 = vrot.lane.b32.xlu2 %v565_v3, %s1193_s22 }
 0x20d   : > { %v607_v4 = vpop.permute.xlu2 %606 }
 0x20e   : > { %610 = vst.msk [vmem:[#allocation3 + $0x8] sm:$0xff] %vm592_vm8, %v607_v4 }
 0x215   : > { %v612_v6 = vpop.permute.xlu2 %611 }
 0x216   : > { %615 = vst.msk [vmem:[#allocation4 + $0x8] sm:$0xff] %vm592_vm8, %v612_v6 }
 0x21d   : > { %v622_v9 = vpop.permute.xlu2 %621 }
 0x21e   : > { %625 = vst.msk [vmem:[#allocation3 + $0x10] sm:$0xff] %vm592_vm8, %v622_v9 }
 0x21f   : > { %v617_v10 = vpop.permute.xlu0 %616 }
 0x220   : > { %620 = vst.msk [vmem:[#allocation2 + $0x10] sm:$0xff] %vm592_vm8, %v617_v10 }
 0x225   : > { %v602_v11 = vpop.permute.xlu2 %601  ;;  %v597_v12 = vpop.permute.xlu1 %596 }
 0x226   : > { %605 = vst.msk [vmem:[#allocation2 + $0x8] sm:$0xff] %vm592_vm8, %v602_v11 }
 0x227   : > { %599 = vst.msk [vmem:[#allocation4] sm:$0xff] %vm592_vm8, %v597_v12  ;;  %v632_v13 = vpop.permute.xlu0 %631 }
 0x228   : > { %635 = vst.msk [vmem:[#allocation2 + $0x18] sm:$0xff] %vm592_vm8, %v632_v13 }
 0x22d   : > { %v637_v14 = vpop.permute.xlu2 %636  ;;  %v627_v16 = vpop.permute.xlu1 %626 }
 0x22e   : > { %640 = vst.msk [vmem:[#allocation3 + $0x18] sm:$0xff] %vm592_vm8, %v637_v14 }
 0x22f   : > { %630 = vst.msk [vmem:[#allocation4 + $0x10] sm:$0xff] %vm592_vm8, %v627_v16 }
 0x235   : > { %v642_v17 = vpop.permute.xlu1 %641 }
 0x236   : > { %645 = vst.msk [vmem:[#allocation4 + $0x18] sm:$0xff] %vm592_vm8, %v642_v17 }
 0x237 LB: >> { %s986_s19 = sshll.u32 %s1186_s17, 3  ;;  %s1566_s3 = sld [smem:[#allocation13_spill]]  ;;  %v728_v34 = vld [vmem:[#allocation5] sm:$0xff]  ;;  %s1186_s17 = sphi %s1390_s17, %s659_s17  }
 0x238   : >> { %s663_s22 = scalar_lea.vmem [#allocation3], %s986_s19  ;;  %s661_s24 = scalar_lea.vmem [#allocation2], %s986_s19 }
 0x239   : >> { %v664_v18 = vld [vmem:[%s663_s22] sm:$0xff]  ;;  %s665_s14 = scalar_lea.vmem [#allocation4], %s986_s19  ;;  %s659_s17 = sadd.s32 1, %s1186_s17  }
 0x23a   : >> { %987 = vmatpush.xpose.msk.msra.mxu0 %vm592_vm8, %v664_v18  ;;  %v662_v19 = vld [vmem:[%s661_s24] sm:$0xff]  ;;  %p656_p12 = scmp.ge.s32.totalorder %s659_s17, 4  }
 0x23b   : > { %v1091_v38 = vld [vmem:[%s1544_s4] ss:$0 sm:$0xff] (%p656_p12)  ;;  %v798_v47 = vld [vmem:[%s1549_s9 + $0x18] sm:$0xff] (%p656_p12)  ;;  %v796_v48 = vld [vmem:[%s1549_s9 + $0x8] sm:$0xff] (%p656_p12)  ;;  %s993_s1 = sshll.u32 (%p656_p12), %s1174_s28, 3  ;;  %s1567_s22 = scalar_lea.vmem (%p656_p12), [#allocation6], %s1357_s16 }
 0x23c   : > { %v795_v49 = vld [vmem:[%s1549_s9] sm:$0xff] (%p656_p12)  ;;  %v850_v50 = vld [vmem:[%s1551_s11 + $0x78] sm:$0xff] (%p656_p12)  ;;  %v849_v51 = vld [vmem:[%s1551_s11 + $0x70] sm:$0xff] (%p656_p12)  ;;  %s1568_s28 = smov (%p656_p12), %s1567_s22  ;;  %s1569_s23 = sand.u32 (%p656_p12), 1, %s1166_s26  }
 0x23d   : >> { %988 = vmatmul.msk.f32.vlgmr.msra.gmra.mxu0 %vm592_vm8, %v662_v19  ;;  %v666_v28 = vld [vmem:[%s665_s14] sm:$0xff]  ;;  %s729_s24 = scalar_lea.vmem %s1566_s3, %s986_s19  ;;  %v848_v52 = vld [vmem:[%s1551_s11 + $0x68] sm:$0xff] (%p656_p12)  ;;  %v846_v5 = vld [vmem:[%s1551_s11 + $0x58] sm:$0xff] (%p656_p12)  ;;  %s889_s19 = scalar_lea.hbm (%p656_p12), %s1553_s13, %s993_s1 }
 0x23e   : >> { %723 = vmatpush.msra.mxu1 %v666_v28  ;;  %v730_v32 = vld [vmem:[%s729_s24] sm:$0xff]  ;;  %818 = vmatpush.msra.mxu0 (%p656_p12), %v798_v47  ;;  %v845_v6 = vld [vmem:[%s1551_s11 + $0x50] sm:$0xff] (%p656_p12)  ;;  %v844_v7 = vld [vmem:[%s1551_s11 + $0x48] sm:$0xff] (%p656_p12)  ;;  %s891_s24 = sshll.u32 (%p656_p12), %s1567_s22, 4  ;;  %s893_s0 = sshll.u32 (%p656_p12), %s889_s19, 4  ;;  %s892_s24 = int_to_ptr.vmem [resolvable:$true] %s891_s24  ;;  %s894_s0 = int_to_ptr.hbm [resolvable:$true] %s893_s0 }
 0x23f   : >> { %749 = vmatpush.msra.mxu2 %v730_v32  ;;  %v847_v55 = vld [vmem:[%s1551_s11 + $0x60] sm:$0xff] (%p656_p12)  ;;  %v842_v9 = vld [vmem:[%s1551_s11 + $0x38] sm:$0xff] (%p656_p12)  ;;  %v841_v10 = vld [vmem:[%s1551_s11 + $0x30] sm:$0xff] (%p656_p12)  ;;  %s878_s2 = scalar_lea.sflag (%p656_p12), [#allocation7], %s1569_s23  ;;  %s1114_s14 = sshra.s32 (%p656_p12), %s894_s0, 4  ;;  %s1115_s14 = int_to_ptr.hbm [resolvable:$true] %s1114_s14 }
 0x240   : > { %v1093_v2 = vld [vmem:[%s1548_s8] ss:$0 sm:$0xff] (%p656_p12)  ;;  %v840_v11 = vld [vmem:[%s1551_s11 + $0x28] sm:$0xff] (%p656_p12)  ;;  %v838_v13 = vld [vmem:[%s1551_s11 + $0x18] sm:$0xff] (%p656_p12)  ;;  %s1116_s3 = scalar_lea.hbm (%p656_p12), %s1115_s14, 8  ;;  %s1120_s17 = scalar_lea.hbm (%p656_p12), %s1553_s13, 16 }
 0x241   : > { %v843_v8 = vld [vmem:[%s1551_s11 + $0x40] sm:$0xff] (%p656_p12)  ;;  %v837_v14 = vld [vmem:[%s1551_s11 + $0x10] sm:$0xff] (%p656_p12)  ;;  %v836_v16 = vld [vmem:[%s1551_s11 + $0x8] sm:$0xff] (%p656_p12)  ;;  %p1117_p13 = scmp.ne.s32.totalorder (%p656_p12), %s1115_s14, %s1116_s3  ;;  %p1121_p2 = scmp.lt.s32.totalorder (%p656_p12), %s1115_s14, %s1553_s13 }
 0x242   : > { %v839_v12 = vld [vmem:[%s1551_s11 + $0x20] sm:$0xff] (%p656_p12)  ;;  %p1122_p3 = scmp.lt.s32.totalorder (%p656_p12), %s1120_s17, %s1116_s3 }
 0x243   : > { %v835_v17 = vld [vmem:[%s1551_s11] sm:$0xff] (%p656_p12)  ;;  %p1118_p0 = pnand (%p656_p12), %p1117_p13, %p1307_p4 }
 0x244   : > { %v1094_v18 = vld [vmem:[%s1550_s10] ss:$0 sm:$0xff] (%p656_p12)  ;;  %p1123_p5 = por (%p656_p12), %p1122_p3, %p1121_p2 }
 0x245   : > { %p1119_p1 = pneg (%p656_p12), %p1118_p0 }
 0x247   : > { %p1124_p6 = pnand (%p656_p12), %p1123_p5, %p1119_p1 }
 0x2ba   : >> { %v690_v20 = vpop.f32.mrf.mxu0 }
 0x2bb   : >> { %v693_v21 = vsel %vm652_vm9, %v690_v20, -1e+30 }
 0x2bc   : >> { %v694_v22 = vsel %vm592_vm8, %v693_v21, -inf }
 0x2bd   : >> { %695 = vmax.xlane.f32.xlu0 %v694_v22 }
 0x330   : >> { %v696_v23 = vpop.xlane.xlu0 %695 }
 0x331   : >> { %v697_v24 = vsub.f32 %v693_v21, %v696_v23 }
 0x333   : >> { %v698_v25 = vmul.f32 1.442695, %v697_v24 }
 0x335   : >> { %1087 = vpow2.f32 %v698_v25 }
 0x33b   : >> { %v1088_v26 = vpop.eup %1087 }
 0x33c   : >> { %v700_v27 = vsel %vm592_vm8, %v1088_v26, 0.0 }
 0x33d   : >> { %701 = vadd.xlane.f32.xlu0 %v700_v27 }
 0x3b0   : >> { %v702_v29 = vpop.xlane.xlu0 %701 }
 0x3b1   : >> { %1089 = vrcp.f32 %v702_v29 }
 0x3b7   : >> { %v1090_v30 = vpop.eup %1089 }
 0x3b8   : >> { %v704_v31 = vmul.f32 %v1090_v30, %v1088_v26  ;;  %v1095_v30 = vld [vmem:[%s1552_s12] ss:$0 sm:$0xff] (%p656_p12) }
 0x3ba   : >> { %989 = vmatmul.msk.f32.vlgmr.msra.gmra.mxu1 %vm592_vm8, %v704_v31 }
 0x3bb   : > { %855 = vmatpush.msra.mxu1 (%p656_p12), %v850_v50 }
 0x3bd   : > { %856 = vmatpush.msra.mxu1 (%p656_p12), %v849_v51 }
 0x3bf   : > { %857 = vmatpush.msra.mxu1 (%p656_p12), %v848_v52 }
 0x3c1   : > { %858 = vmatpush.msra.mxu1 (%p656_p12), %v847_v55 }
 0x3c3   : > { %859 = vmatpush.msra.mxu1 (%p656_p12), %v846_v5 }
 0x3c5   : > { %860 = vmatpush.msra.mxu1 (%p656_p12), %v845_v6 }
 0x3c7   : > { %861 = vmatpush.msra.mxu1 (%p656_p12), %v844_v7 }
 0x3c9   : > { %862 = vmatpush.msra.mxu1 (%p656_p12), %v843_v8 }
 0x3cb   : > { %863 = vmatpush.msra.mxu1 (%p656_p12), %v842_v9 }
 0x3cd   : > { %864 = vmatpush.msra.mxu1 (%p656_p12), %v841_v10 }
 0x3cf   : > { %865 = vmatpush.msra.mxu1 (%p656_p12), %v840_v11 }
 0x3d1   : > { %866 = vmatpush.msra.mxu1 (%p656_p12), %v839_v12 }
 0x3d3   : > { %867 = vmatpush.msra.mxu1 (%p656_p12), %v838_v13 }
 0x3d5   : > { %868 = vmatpush.msra.mxu1 (%p656_p12), %v837_v14 }
 0x3d7   : > { %869 = vmatpush.msra.mxu1 (%p656_p12), %v836_v16 }
 0x3d9   : > { %870 = vmatpush.msra.mxu1 (%p656_p12), %v835_v17 }
 0x437   : >> { %v725_v33 = vpop.f32.mrf.mxu1 }
 0x438   : >> { %990 = vmatmul.msk.f32.vlgmr.msra.gmra.mxu2 %vm592_vm8, %v725_v33 }
 0x4ba   : > { %658 = sbr.rel (!%p656_p12) target bundleno = 567 (0x237), region = 128 }
 0x4bb   : >> { %v751_v35 = vpop.f32.mrf.mxu2 }
 0x4bc   : >> { %v754_v36 = vadd.f32 %v751_v35, %v728_v34 }
 0x4be   : >> { %755 = vst.msk [vmem:[#allocation5] sm:$0xff] %vm456_vm0, %v754_v36 }
 0x4c5   : > { %v756_v37 = vld [vmem:[#allocation5] sm:$0xff] }
 0x4c6   : > { %v757_v39 = vadd.f32 %v756_v37, %v1328_v1  ;;  %v797_v1 = vld [vmem:[%s1549_s9 + $0x10] sm:$0xff] }
 0x4c7   : > { %819 = vmatpush.msra.mxu0 %v797_v1 }
 0x4c8   : > { %v1415_v40 = vadd.f32 %v1091_v38, %v757_v39 }
 0x4c9   : > { %820 = vmatpush.msra.mxu0 %v796_v48 }
 0x4ca   : > { %v765_v41 = vsel %vm456_vm0, %v1415_v40, 0.0 }
 0x4cb   : > { %766 = vadd.xlane.f32.xlu0 %v765_v41  ;;  %821 = vmatpush.msra.mxu0 %v795_v49 }
 0x53e   : > { %v767_v42 = vpop.xlane.xlu0 %766 }
 0x53f   : > { %v768_v43 = vmul.f32 %v767_v42, %v1346_v15 }
 0x541   : > { %v769_v44 = vsub.f32 %v1415_v40, %v768_v43 }
 0x543   : > { %v770_v45 = vmul.f32 %v769_v44, %v769_v44 }
 0x545   : > { %v771_v46 = vsel %vm456_vm0, %v770_v45, 0.0 }
 0x546   : > { %772 = vadd.xlane.f32.xlu0 %v771_v46 }
 0x5b9   : > { %v773_v53 = vpop.xlane.xlu0 %772 }
 0x5ba   : > { %v774_v54 = vmul.f32 %v773_v53, %v1346_v15  ;;  %v1092_v15 = vld [vmem:[%s1547_s7] ss:$0 sm:$0xff] }
 0x5bc   : > { %v775_v56 = vadd.f32 1e-05, %v774_v54 }
 0x5be   : > { %1096 = vrsqrt.f32 %v775_v56  ;;  %vm782_vm11 = vweird.f32 %v775_v56 }
 0x5c4   : > { %v1097_v57 = vpop.eup %1096 }
 0x5c5   : > { %v777_v58 = vmul.f32 %v1097_v57, %v775_v56  ;;  %vm783_vm10 = vweird.f32 %v1097_v57 }
 0x5c6   : > { %vm784_vm12 = vmor %vm782_vm11, %vm783_vm10 }
 0x5c7   : > { %v778_v59 = vmul.f32 %v1097_v57, %v777_v58 }
 0x5c9   : > { %v779_v60 = vmul.f32 0.5, %v778_v59 }
 0x5cb   : > { %v780_v61 = vsub.f32 1.5, %v779_v60 }
 0x5cd   : > { %v781_v62 = vmul.f32 %v1097_v57, %v780_v61 }
 0x5cf   : > { %v785_v63 = vsel %vm784_vm12, %v1097_v57, %v781_v62 }
 0x5d0   : > { %v786_v0 = vmul.f32 %v785_v63, %v769_v44 }
 0x5d2   : > { %v790_v3 = vmul.f32 %v1092_v15, %v786_v0 }
 0x5d4   : > { %v794_v4 = vadd.f32 %v1093_v2, %v790_v3 }
 0x5d6   : > { %991 = vmatmul.msk.f32.vlgmr.msra.gmra.mxu0 %vm456_vm0, %v794_v4 }
 0x653   : > { %v823_v19 = vpop.f32.mrf.mxu0 }
 0x654   : > { %v824_v20 = vadd.f32 %v1094_v18, %v823_v19 }
 0x656   : > { %v827_v21 = vmul.f32 0.044715, %v824_v20  ;;  %v826_v27 = vmul.f32 0.5, %v824_v20 }
 0x658   : > { %v828_v22 = vmul.f32 %v827_v21, %v824_v20 }
 0x65a   : > { %v829_v23 = vmul.f32 %v828_v22, %v824_v20 }
 0x65c   : > { %v830_v24 = vadd.f32 %v829_v23, %v824_v20 }
 0x65e   : > { %v831_v25 = vmul.f32 0.7978846, %v830_v24 }
 0x660   : > { %1098 = vtanh.f32 %v831_v25 }
 0x666   : > { %v1099_v26 = vpop.eup %1098 }
 0x667   : > { %v833_v28 = vadd.f32 1.0, %v1099_v26 }
 0x669   : > { %v834_v29 = vmul.f32 %v833_v28, %v826_v27 }
 0x66b   : > { %871 = vmatmul.f32.vlgmr.msra.gmra.mxu1 %v834_v29 }
 0x6e8   : > { %v872_v31 = vpop.f32.mrf.mxu1 }
 0x6e9   : > { %v873_v32 = vadd.f32 %v1095_v30, %v872_v31 }
 0x6eb   : > { %v875_v33 = vadd.f32 %v873_v32, %v1415_v40 }
 0x6ed   : > { %876 = vst.msk [vmem:[%s1568_s28] sm:$0xff] %vm456_vm0, %v875_v33 }
 0x6ee   : > { %1127 = shalt.err (!%p1124_p6)
}
 0x6ef   : > { %996 = dma.vmem_to_hbm [thread:$0]  (%p1307_p4), %s892_s24, 128, %s894_s0, %s878_s2  }
 0x6f0 PF: > { %p1002_p7 = scmp.ge.s32.totalorder %s1182_s30, 2  ;;  %s905_s16 = sand.u32 1, %s1162_s25  }
 0x6f1   : > { %s906_s28 = scalar_lea.sflag [#allocation7], %s905_s16 }
 0x6f2   : > { %p999_p9 = pnand %p1002_p7, %p1314_p8 }
 0x6f4   : > { %p1000_p10 = pneg %p999_p9 }
 0x6f6   : > { %1157 = dma.done.wait (%p1000_p10), %s906_s28, 128  }
 0x6f7   : > { %1159 = vsyncadd (%p1000_p10), %s906_s28, 4294967168  ;;  %s26_s30 = sadd.s32 1, %s1182_s30   ;;  %s1570_s3 = sld [smem:[#allocation9_spill]] }
 0x6f8   : > { %p23_p11 = scmp.ge.s32.totalorder %s26_s30, 4   ;;  %s1571_s25 = smov %s1166_s26 }
 0x6f9   : > { %s1572_s26 = smov %s1170_s27  ;;  %s1573_s27 = smov %s1320_s21 }
 0x6fa   : > { %s1574_s28 = smov %s1178_s29  ;;  %25 = sbr.rel (!%p23_p11) target bundleno = 9 (0x9), region = 139 }
 0x6fd   : > { %s1575_s29 = smov %s1570_s3 }
 0x6ff   :  { %912 = vsyncpa [#allocation7], 1 }
 0x700   :  { %914 = vsyncpa [#allocation7 + $0x1], 1 }

</bundles_post_ra>
